<compile_context>
chip_gen: v6e
topology: v6e:2x2x1
jax: 0.10.0
libtpu: 0.0.40
codegen_flags: <defaults>
</compile_context>

<pallas_src>
import functools

import jax
import jax.numpy as jnp
from jax.experimental import pallas as pl
from jax.experimental.pallas import tpu as pltpu

IN_DIM = 128
H1_DIM = 256
H2_DIM = 512
OUT_DIM = 784
OUT_PAD = 896  # 7 * 128 -> lane-dense output stores


def _round_up(n, m):
    return ((n + m - 1) // m) * m


def _generator_kernel(x_ref, w1_ref, b1_ref, w2_ref, b2_ref, w3_ref, b3_ref,
                      o_ref):
    # fc1 + leaky_relu(0.2): bf16 operands, f32 accumulation + elementwise.
    x = x_ref[...].astype(jnp.bfloat16)
    h = jnp.dot(x, w1_ref[...], preferred_element_type=jnp.float32)
    h = h + b1_ref[...]
    h = jnp.where(h > 0, h, 0.2 * h)
    # fc2 + leaky_relu(0.2)
    h = jnp.dot(h.astype(jnp.bfloat16), w2_ref[...],
                preferred_element_type=jnp.float32)
    h = h + b2_ref[...]
    h = jnp.where(h > 0, h, 0.2 * h)
    # fc3 (padded to 896 cols) + tanh
    h = jnp.dot(h.astype(jnp.bfloat16), w3_ref[...],
                preferred_element_type=jnp.float32)
    h = h + b3_ref[...]
    o_ref[...] = jnp.tanh(h).astype(o_ref.dtype)


def prepare_params(params):
    """f32 (in,out)/(1,out) params -> bf16 weights + lane-padded fc3."""
    w1, b1, w2, b2, w3, b3 = params
    pad = OUT_PAD - OUT_DIM
    w3p = jnp.pad(w3, ((0, 0), (0, pad)))
    b3p = jnp.pad(b3, ((0, 0), (0, pad)))
    return (w1.astype(jnp.bfloat16), b1.astype(jnp.float32),
            w2.astype(jnp.bfloat16), b2.astype(jnp.float32),
            w3p.astype(jnp.bfloat16), b3p.astype(jnp.float32))


@functools.partial(jax.jit, static_argnames=("tm",))
def my_generator_forward(x, kernel_params, *, tm=256):
    """x: (B, 128) float32 -> (B, 784) float32."""
    w1, b1, w2, b2, w3, b3 = kernel_params
    B = x.shape[0]

    # Choose a batch tile: full MXU height when possible, else the 8-padded
    # batch. Pad the batch so the grid divides evenly.
    b_pad = _round_up(max(B, 8), 8)
    tile_m = tm if b_pad >= tm else b_pad
    b_pad = _round_up(b_pad, tile_m)
    if b_pad != B:
        x = jnp.pad(x, ((0, b_pad - B), (0, 0)))

    grid = (b_pad // tile_m,)

    def resident(a):
        return pl.BlockSpec(a.shape, lambda i: (0, 0))

    flops = 2 * b_pad * (IN_DIM * H1_DIM + H1_DIM * H2_DIM + H2_DIM * OUT_PAD)
    bytes_accessed = (b_pad * IN_DIM * 4                       # x (f32)
                      + 2 * (IN_DIM * H1_DIM + H1_DIM * H2_DIM
                             + H2_DIM * OUT_PAD)               # bf16 weights
                      + 4 * (H1_DIM + H2_DIM + OUT_PAD)        # f32 biases
                      + b_pad * OUT_PAD * 4)                   # out (f32)

    out_padded = pl.pallas_call(
        _generator_kernel,
        out_shape=jax.ShapeDtypeStruct((b_pad, OUT_PAD), jnp.float32),
        grid=grid,
        in_specs=[
            pl.BlockSpec((tile_m, IN_DIM), lambda i: (i, 0)),   # streamed x
            resident(w1), resident(b1),                         # weights stay
            resident(w2), resident(b2),                         # in VMEM for
            resident(w3), resident(b3),                         # all steps
        ],
        out_specs=pl.BlockSpec((tile_m, OUT_PAD), lambda i: (i, 0)),
        compiler_params=pltpu.CompilerParams(
            dimension_semantics=("parallel",)),
        cost_estimate=pl.CostEstimate(
            flops=flops,
            transcendentals=b_pad * OUT_PAD,
            bytes_accessed=bytes_accessed),
    )(x, w1, b1, w2, b2, w3, b3)

    return out_padded[:B, :OUT_DIM]


def init_params(key):
    """Deterministic init matching nn.Linear shapes (weights stored (in,out))."""
    dims = [(IN_DIM, H1_DIM), (H1_DIM, H2_DIM), (H2_DIM, OUT_DIM)]
    params = []
    for (din, dout) in dims:
        key, kw, kb = jax.random.split(key, 3)
        bound = 1.0 / jnp.sqrt(jnp.float32(din))
        w = jax.random.uniform(kw, (din, dout), jnp.float32, -bound, bound)
        b = jax.random.uniform(kb, (1, dout), jnp.float32, -bound, bound)
        params += [w, b]
    return tuple(params)


def reference_forward_bf16(x, params):
    """Pure-JAX reference with the same bf16-matmul / f32-accumulate recipe."""
    w1, b1, w2, b2, w3, b3 = params
    bf = jnp.bfloat16
    h = jnp.dot(x.astype(bf), w1.astype(bf),
                preferred_element_type=jnp.float32) + b1
    h = jnp.where(h > 0, h, 0.2 * h)
    h = jnp.dot(h.astype(bf), w2.astype(bf),
                preferred_element_type=jnp.float32) + b2
    h = jnp.where(h > 0, h, 0.2 * h)
    h = jnp.dot(h.astype(bf), w3.astype(bf),
                preferred_element_type=jnp.float32) + b3
    return jnp.tanh(h)


def reference_forward_f32(x, params):
    """Full-f32 reference matching the PyTorch module exactly."""
    w1, b1, w2, b2, w3, b3 = params
    h = x @ w1 + b1
    h = jnp.where(h > 0, h, 0.2 * h)
    h = h @ w2 + b2
    h = jnp.where(h > 0, h, 0.2 * h)
    h = h @ w3 + b3
    return jnp.tanh(h)


if __name__ == "__main__":
    key = jax.random.PRNGKey(0)
    kx, kp = jax.random.split(key)

    batch = 8
    x = jax.random.normal(kx, (batch, IN_DIM), jnp.float32)
    params = init_params(kp)
    kernel_params = prepare_params(params)

    out = my_generator_forward(x, kernel_params)
    out = jax.block_until_ready(out)
    assert out.shape == (batch, OUT_DIM)

    # Tight check vs. a reference using the same bf16-matmul recipe.
    ref_bf16 = reference_forward_bf16(x, params)
    assert jnp.allclose(out, ref_bf16, atol=1e-3, rtol=1e-3), \
        "mismatch vs bf16 reference"

    # Loose check vs. full-f32 math (only bf16 weight-quantization drift).
    ref_f32 = reference_forward_f32(x, params)
    assert jnp.max(jnp.abs(out - ref_f32)) < 5e-2, "bf16 drift too large"

    print("KERNEL_OK")
</pallas_src>

<mosaic_0001>
module attributes {stable_mosaic.version = 11 : i64} {
  func.func @_generator_kernel(%arg0: i32, %arg1: memref<8x128xf32, #tpu.memory_space<vmem>>, %arg2: memref<128x256xbf16, #tpu.memory_space<vmem>>, %arg3: memref<1x256xf32, #tpu.memory_space<vmem>>, %arg4: memref<256x512xbf16, #tpu.memory_space<vmem>>, %arg5: memref<1x512xf32, #tpu.memory_space<vmem>>, %arg6: memref<512x896xbf16, #tpu.memory_space<vmem>>, %arg7: memref<1x896xf32, #tpu.memory_space<vmem>>, %arg8: memref<8x896xf32, #tpu.memory_space<vmem>>) attributes {dimension_semantics = [#tpu.dimension_semantics<parallel>], iteration_bounds = array<i64: 1>, scalar_prefetch = 0 : i64, scratch_operands = 0 : i64, tpu.core_type = #tpu.core_type<tc>, window_params = [{transform_indices = @transform_0, window_bounds = array<i64: 8, 128>}, {pipeline_mode = #tpu.pipeline_mode<synchronous>, transform_indices = @transform_1, window_bounds = array<i64: 128, 256>}, {pipeline_mode = #tpu.pipeline_mode<synchronous>, transform_indices = @transform_2, window_bounds = array<i64: 1, 256>}, {pipeline_mode = #tpu.pipeline_mode<synchronous>, transform_indices = @transform_3, window_bounds = array<i64: 256, 512>}, {pipeline_mode = #tpu.pipeline_mode<synchronous>, transform_indices = @transform_4, window_bounds = array<i64: 1, 512>}, {pipeline_mode = #tpu.pipeline_mode<synchronous>, transform_indices = @transform_5, window_bounds = array<i64: 512, 896>}, {pipeline_mode = #tpu.pipeline_mode<synchronous>, transform_indices = @transform_6, window_bounds = array<i64: 1, 896>}, {transform_indices = @transform_7, window_bounds = array<i64: 8, 896>}]} {
    %c0 = arith.constant 0 : index
    %c0_0 = arith.constant 0 : index
    %0 = vector.load %arg1[%c0, %c0_0] : memref<8x128xf32, #tpu.memory_space<vmem>>, vector<8x128xf32>
    %1 = arith.truncf %0 : vector<8x128xf32> to vector<8x128xbf16>
    %c0_1 = arith.constant 0 : index
    %c0_2 = arith.constant 0 : index
    %2 = vector.load %arg2[%c0_1, %c0_2] : memref<128x256xbf16, #tpu.memory_space<vmem>>, vector<128x256xbf16>
    %cst = arith.constant dense<0.000000e+00> : vector<8x256xf32>
    %3 = tpu.matmul %1, %2, %cst {dimension_numbers = #tpu.dot_dimension_numbers<[1], [0], [0], [1], [0, 0, 1, 1], [], []>} : vector<8x128xbf16>, vector<128x256xbf16>, vector<8x256xf32> -> vector<8x256xf32>
    %c0_3 = arith.constant 0 : index
    %c0_4 = arith.constant 0 : index
    %4 = vector.load %arg3[%c0_3, %c0_4] : memref<1x256xf32, #tpu.memory_space<vmem>>, vector<1x256xf32>
    %5 = vector.broadcast %4 : vector<1x256xf32> to vector<8x256xf32>
    %6 = arith.addf %3, %5 : vector<8x256xf32>
    %cst_5 = arith.constant 0.000000e+00 : f32
    %7 = vector.broadcast %cst_5 : f32 to vector<8x256xf32>
    %8 = arith.cmpf ogt, %6, %7 : vector<8x256xf32>
    %cst_6 = arith.constant 2.000000e-01 : f32
    %9 = vector.broadcast %cst_6 : f32 to vector<8x256xf32>
    %10 = arith.mulf %9, %6 : vector<8x256xf32>
    %11 = arith.select %8, %6, %10 : vector<8x256xi1>, vector<8x256xf32>
    %12 = arith.truncf %11 : vector<8x256xf32> to vector<8x256xbf16>
    %c0_7 = arith.constant 0 : index
    %c0_8 = arith.constant 0 : index
    %13 = vector.load %arg4[%c0_7, %c0_8] : memref<256x512xbf16, #tpu.memory_space<vmem>>, vector<256x512xbf16>
    %cst_9 = arith.constant dense<0.000000e+00> : vector<8x512xf32>
    %14 = tpu.matmul %12, %13, %cst_9 {dimension_numbers = #tpu.dot_dimension_numbers<[1], [0], [0], [1], [0, 0, 1, 1], [], []>} : vector<8x256xbf16>, vector<256x512xbf16>, vector<8x512xf32> -> vector<8x512xf32>
    %c0_10 = arith.constant 0 : index
    %c0_11 = arith.constant 0 : index
    %15 = vector.load %arg5[%c0_10, %c0_11] : memref<1x512xf32, #tpu.memory_space<vmem>>, vector<1x512xf32>
    %16 = vector.broadcast %15 : vector<1x512xf32> to vector<8x512xf32>
    %17 = arith.addf %14, %16 : vector<8x512xf32>
    %cst_12 = arith.constant 0.000000e+00 : f32
    %18 = vector.broadcast %cst_12 : f32 to vector<8x512xf32>
    %19 = arith.cmpf ogt, %17, %18 : vector<8x512xf32>
    %cst_13 = arith.constant 2.000000e-01 : f32
    %20 = vector.broadcast %cst_13 : f32 to vector<8x512xf32>
    %21 = arith.mulf %20, %17 : vector<8x512xf32>
    %22 = arith.select %19, %17, %21 : vector<8x512xi1>, vector<8x512xf32>
    %23 = arith.truncf %22 : vector<8x512xf32> to vector<8x512xbf16>
    %c0_14 = arith.constant 0 : index
    %c0_15 = arith.constant 0 : index
    %24 = vector.load %arg6[%c0_14, %c0_15] : memref<512x896xbf16, #tpu.memory_space<vmem>>, vector<512x896xbf16>
    %cst_16 = arith.constant dense<0.000000e+00> : vector<8x896xf32>
    %25 = tpu.matmul %23, %24, %cst_16 {dimension_numbers = #tpu.dot_dimension_numbers<[1], [0], [0], [1], [0, 0, 1, 1], [], []>} : vector<8x512xbf16>, vector<512x896xbf16>, vector<8x896xf32> -> vector<8x896xf32>
    %c0_17 = arith.constant 0 : index
    %c0_18 = arith.constant 0 : index
    %26 = vector.load %arg7[%c0_17, %c0_18] : memref<1x896xf32, #tpu.memory_space<vmem>>, vector<1x896xf32>
    %27 = vector.broadcast %26 : vector<1x896xf32> to vector<8x896xf32>
    %28 = arith.addf %25, %27 : vector<8x896xf32>
    %29 = math.tanh %28 : vector<8x896xf32>
    %c0_19 = arith.constant 0 : index
    %c0_20 = arith.constant 0 : index
    %30 = vector.load %arg8[%c0_19, %c0_20] : memref<8x896xf32, #tpu.memory_space<vmem>>, vector<8x896xf32>
    tpu.vector_store %arg8[%c0_19, %c0_20], %29 {strides = array<i32>} : memref<8x896xf32, #tpu.memory_space<vmem>>, vector<8x896xf32>,
    return
  }
  func.func @transform_0(%arg0: i32) -> (i32, i32) {
    %c0_i32 = arith.constant 0 : i32
    %c0_i32_0 = arith.constant 0 : i32
    return %arg0, %c0_i32 : i32, i32
  }
  func.func @transform_1(%arg0: i32) -> (i32, i32) {
    %c0_i32 = arith.constant 0 : i32
    %c0_i32_0 = arith.constant 0 : i32
    %c0_i32_1 = arith.constant 0 : i32
    return %c0_i32, %c0_i32_0 : i32, i32
  }
  func.func @transform_2(%arg0: i32) -> (i32, i32) {
    %c0_i32 = arith.constant 0 : i32
    %c0_i32_0 = arith.constant 0 : i32
    %c0_i32_1 = arith.constant 0 : i32
    return %c0_i32, %c0_i32_0 : i32, i32
  }
  func.func @transform_3(%arg0: i32) -> (i32, i32) {
    %c0_i32 = arith.constant 0 : i32
    %c0_i32_0 = arith.constant 0 : i32
    %c0_i32_1 = arith.constant 0 : i32
    return %c0_i32, %c0_i32_0 : i32, i32
  }
  func.func @transform_4(%arg0: i32) -> (i32, i32) {
    %c0_i32 = arith.constant 0 : i32
    %c0_i32_0 = arith.constant 0 : i32
    %c0_i32_1 = arith.constant 0 : i32
    return %c0_i32, %c0_i32_0 : i32, i32
  }
  func.func @transform_5(%arg0: i32) -> (i32, i32) {
    %c0_i32 = arith.constant 0 : i32
    %c0_i32_0 = arith.constant 0 : i32
    %c0_i32_1 = arith.constant 0 : i32
    return %c0_i32, %c0_i32_0 : i32, i32
  }
  func.func @transform_6(%arg0: i32) -> (i32, i32) {
    %c0_i32 = arith.constant 0 : i32
    %c0_i32_0 = arith.constant 0 : i32
    %c0_i32_1 = arith.constant 0 : i32
    return %c0_i32, %c0_i32_0 : i32, i32
  }
  func.func @transform_7(%arg0: i32) -> (i32, i32) {
    %c0_i32 = arith.constant 0 : i32
    %c0_i32_0 = arith.constant 0 : i32
    return %arg0, %c0_i32 : i32, i32
  }
}

</mosaic_0001>

<bundles_post_ra>
// kernel: my_generator_forward.1
= control target key start
LH: loop header
LB: loop body
LE: loop exit
PB: predicated region body
PF: predicated region fallthrough
CT: control target
= control target key end

     0   :  { %12 = vsyncpa [#allocation3], 0  ;;  %s3637_s0 = inlined_call_operand.hbm [shape: f32[8,128], index: 0, kind: input, shape index: {}]   ;;  %s3638_s1 = inlined_call_operand.hbm [shape: bf16[128,256], index: 1, kind: input, shape index: {}]   ;;  %s3639_s2 = inlined_call_operand.vmem [shape: f32[1,256], index: 2, kind: input, shape index: {}]   ;;  %s3640_s3 = inlined_call_operand.hbm [shape: bf16[256,512], index: 3, kind: input, shape index: {}]   ;;  %s3641_s4 = inlined_call_operand.hbm [shape: f32[1,512], index: 4, kind: input, shape index: {}]   ;;  %s3642_s5 = inlined_call_operand.hbm [shape: bf16[512,896], index: 5, kind: input, shape index: {}]   ;;  %s3643_s6 = inlined_call_operand.vmem [shape: f32[1,896], index: 6, kind: input, shape index: {}]   ;;  %s3644_s7 = inlined_call_operand.hbm [shape: f32[8,896], index: 7, kind: output, shape index: {}]  }
   0x1   :  { %13 = vsyncpa [#allocation6], 0 }
   0x2   :  { %14 = vsyncpa [#allocation9], 0 }
   0x3   :  { %15 = vsyncpa [#allocation4], 0  ;;  %s3500_s24 = smov [#allocation5]  }
   0x4   :  { %s31_s25 = sshll.u32 %s3500_s24, 4  ;;  %s32_s25 = int_to_ptr.vmem [resolvable:$true] %s31_s25 }
   0x5   :  { %s3380_s26 = scalar_lea.vmem %s32_s25, 2048  ;;  %p3385_p1 = scmp.lt.s32.totalorder %s32_s25, %s32_s25 }
   0x6   :  { %p3381_p0 = scmp.ne.s32.totalorder %s32_s25, %s3380_s26  ;;  %p3386_p2 = scmp.lt.s32.totalorder %s3380_s26, %s3380_s26 }
   0x8   :  { %p3387_p3 = por %p3386_p2, %p3385_p1 }
   0xa   :  { %p3388_p4 = pnand %p3387_p3, %p3381_p0 }
   0xc   :  { %3391 = shalt.err (!%p3388_p4)
}
   0xd   :  { %s3501_s27 = smov 128   ;;  %s3502_s28 = smov 8  }
   0xe   :  { %37 = dma.hbm_to_vmem [thread:$0]  %s3638_s1, 2048, %s32_s25, [#allocation6], %s3501_s27, %s3501_s27, %s3502_s28  }
   0xf   :  { %s3503_s8 = smov [#allocation8]   ;;  %s3504_s10 = smov [#allocation2]  }
  0x10   :  { %s58_s9 = sshll.u32 %s3503_s8, 4  ;;  %s22_s11 = sshll.u32 %s3504_s10, 4  ;;  %s59_s9 = int_to_ptr.vmem [resolvable:$true] %s58_s9  ;;  %s23_s11 = int_to_ptr.vmem [resolvable:$true] %s22_s11 }
  0x11   :  { %s3400_s12 = scalar_lea.vmem %s59_s9, 64  ;;  %p3405_p6 = scmp.lt.s32.totalorder %s59_s9, %s59_s9 }
  0x12   :  { %p3401_p5 = scmp.ne.s32.totalorder %s59_s9, %s3400_s12  ;;  %p3406_p7 = scmp.lt.s32.totalorder %s3400_s12, %s3400_s12 }
  0x14   :  { %p3407_p8 = por %p3406_p7, %p3405_p6 }
  0x16   :  { %p3408_p9 = pnand %p3407_p8, %p3401_p5 }
  0x18   :  { %3411 = shalt.err (!%p3408_p9)
}
  0x19   :  { %61 = dma.hbm_to_vmem [thread:$0]  %s3641_s4, 64, %s59_s9, [#allocation9]  }
  0x1a   :  { %s3420_s15 = scalar_lea.vmem %s23_s11, 128  ;;  %p3425_p11 = scmp.lt.s32.totalorder %s23_s11, %s23_s11 }
  0x1b   :  { %p3421_p10 = scmp.ne.s32.totalorder %s23_s11, %s3420_s15  ;;  %p3426_p12 = scmp.lt.s32.totalorder %s3420_s15, %s3420_s15 }
  0x1d   :  { %p3427_p13 = por %p3426_p12, %p3425_p11 }
  0x1f   :  { %p3428_p0 = pnand %p3427_p13, %p3421_p10 }
  0x21   :  { %3431 = shalt.err (!%p3428_p0)
}
  0x22   :  { %25 = dma.hbm_to_vmem [thread:$0]  %s3637_s0, 128, %s23_s11, [#allocation3]  }
  0x23   :  { %s3505_s17 = smov [#allocation7]  }
  0x24   :  { %s45_s18 = sshll.u32 %s3505_s17, 4  ;;  %s46_s18 = int_to_ptr.vmem [resolvable:$true] %s45_s18 }
  0x25   :  { %s3440_s19 = scalar_lea.vmem %s46_s18, 8192  ;;  %p3445_p2 = scmp.lt.s32.totalorder %s46_s18, %s46_s18 }
  0x26   :  { %p3441_p1 = scmp.ne.s32.totalorder %s46_s18, %s3440_s19  ;;  %p3446_p3 = scmp.lt.s32.totalorder %s3440_s19, %s3440_s19 }
  0x28   :  { %p3447_p4 = por %p3446_p3, %p3445_p2 }
  0x2a   :  { %p3448_p5 = pnand %p3447_p4, %p3441_p1 }
  0x2c   :  { %3451 = shalt.err (!%p3448_p5)
}
  0x2d   :  { %s3506_s4 = smov 256   ;;  %s3507_s20 = smov 16  }
  0x2e   :  { %51 = dma.hbm_to_vmem [thread:$0]  %s3640_s3, 8192, %s46_s18, [#allocation6], %s3506_s4, %s3506_s4, %s3507_s20  }
  0x2f   :  { %s3508_s23 = smov [#allocation10]  }
  0x30   :  { %s67_s24 = sshll.u32 %s3508_s23, 4  ;;  %s68_s24 = int_to_ptr.vmem [resolvable:$true] %s67_s24 }
  0x31   :  { %s3460_s0 = scalar_lea.vmem %s68_s24, 28672  ;;  %p3465_p7 = scmp.lt.s32.totalorder %s68_s24, %s68_s24 }
  0x32   :  { %p3461_p6 = scmp.ne.s32.totalorder %s68_s24, %s3460_s0  ;;  %p3466_p8 = scmp.lt.s32.totalorder %s3460_s0, %s3460_s0 }
  0x34   :  { %p3467_p9 = por %p3466_p8, %p3465_p7 }
  0x36   :  { %p3468_p10 = pnand %p3467_p9, %p3461_p6 }
  0x38   :  { %3471 = shalt.err (!%p3468_p10)
}
  0x39   :  { %s3509_s25 = smov 448   ;;  %s3510_s26 = smov 28  }
  0x3a   :  { %73 = dma.hbm_to_vmem [thread:$0]  %s3642_s5, 28672, %s68_s24, [#allocation9], %s3509_s25, %s3509_s25, %s3510_s26  }
  0x3b   :  { %3492 = dma.done.wait [#allocation3], 128  }
  0x3c   :  { %3493 = vsyncadd [#allocation3], 4294967168 }
  0x3d   :  { %3494 = dma.done.wait [#allocation6], 10240  }
  0x3e   :  { %3495 = vsyncadd [#allocation6], 4294957056 }
  0x3f   :  { %3496 = dma.done.wait [#allocation9], 28736  }
  0x40   :  { %3497 = vsyncadd [#allocation9], 4294938560  ;;  %v3511_v0 = vmov 0   ;;  %v2918_v1 = vld [vmem:[#allocation5 + $0x74] ss:$8 sps:$4 sm:$0xff]  }
  0x41   :  { %234 = vmatprep.mubr.bf16.mxu0 %v3511_v0  ;;  %v2920_v2 = vld [vmem:[#allocation5 + $0x70] ss:$8 sps:$4 sm:$0xff]   ;;  %202 = vmatprep.subr.bf16.mxu0 %v2918_v1  ;;  %v2921_v3 = vld [vmem:[#allocation5 + $0x64] ss:$8 sps:$4 sm:$0xff]   ;;  %v2923_v4 = vld [vmem:[#allocation5 + $0x60] ss:$8 sps:$4 sm:$0xff]  }
  0x42   :  { %203 = vmatpush1.bf16.msra.mxu0 %v2920_v2  ;;  %v2924_v5 = vld [vmem:[#allocation5 + $0x54] ss:$8 sps:$4 sm:$0xff]   ;;  %v2926_v6 = vld [vmem:[#allocation5 + $0x50] ss:$8 sps:$4 sm:$0xff]   ;;  %v2927_v7 = vld [vmem:[#allocation5 + $0x44] ss:$8 sps:$4 sm:$0xff]  }
  0x43   :  { %204 = vmatprep.subr.bf16.mxu0 %v2921_v3  ;;  %v2929_v8 = vld [vmem:[#allocation5 + $0x40] ss:$8 sps:$4 sm:$0xff]   ;;  %v2942_v9 = vld [vmem:[#allocation7 + $0xe4] ss:$16 sps:$4 sm:$0xff]   ;;  %v2932_v13 = vld [vmem:[#allocation5 + $0x30] ss:$8 sps:$4 sm:$0xff]  }
  0x44   :  { %v2930_v10 = vld [vmem:[#allocation5 + $0x34] ss:$8 sps:$4 sm:$0xff]   ;;  %657 = vmatprep.subr.bf16.mxu1 %v2942_v9  ;;  %v2947_v11 = vld [vmem:[#allocation7 + $0xe0] ss:$16 sps:$4 sm:$0xff]   ;;  %v2933_v14 = vld [vmem:[#allocation5 + $0x24] ss:$8 sps:$4 sm:$0xff]  }
  0x45   :  { %v2948_v12 = vld [vmem:[#allocation7 + $0xc4] ss:$16 sps:$4 sm:$0xff]   ;;  %658 = vmatpush1.bf16.msra.mxu1 %v2947_v11  ;;  %v2953_v15 = vld [vmem:[#allocation7 + $0xc0] ss:$16 sps:$4 sm:$0xff]   ;;  %v92_v26 = vld [vmem:[#allocation2] sm:$0xff] }
  0x46   :  { %205 = vmatpush1.bf16.msra.mxu0 %v2923_v4  ;;  %659 = vmatprep.subr.bf16.mxu1 %v2948_v12  ;;  %v2954_v16 = vld [vmem:[#allocation7 + $0xa4] ss:$16 sps:$4 sm:$0xff]   ;;  %v2935_v17 = vld [vmem:[#allocation5 + $0x20] ss:$8 sps:$4 sm:$0xff]   ;;  %v2938_v21 = vld [vmem:[#allocation5 + $0x10] ss:$8 sps:$4 sm:$0xff]   ;;  %v93_v30 = vpack.c.bf16 %v92_v26, %v92_v26 }
  0x47   :  { %206 = vmatprep.subr.bf16.mxu0 %v2924_v5  ;;  %v2936_v18 = vld [vmem:[#allocation5 + $0x14] ss:$8 sps:$4 sm:$0xff]   ;;  %v2959_v19 = vld [vmem:[#allocation7 + $0xa0] ss:$16 sps:$4 sm:$0xff]   ;;  %v2939_v22 = vld [vmem:[#allocation5 + $0x4] ss:$8 sps:$4 sm:$0xff]  }
  0x48   :  { %v2960_v20 = vld [vmem:[#allocation7 + $0x84] ss:$16 sps:$4 sm:$0xff]   ;;  %v2965_v23 = vld [vmem:[#allocation7 + $0x80] ss:$16 sps:$4 sm:$0xff]   ;;  %v2946_v27 = vld [vmem:[#allocation7 + $0xec] ss:$16 sps:$4 sm:$0xff]  }
  0x49   :  { %660 = vmatpush1.bf16.msra.mxu1 %v2953_v15  ;;  %v2966_v24 = vld [vmem:[#allocation7 + $0x64] ss:$16 sps:$4 sm:$0xff]   ;;  %v2941_v25 = vld [vmem:[#allocation5] ss:$8 sps:$4 sm:$0xff]   ;;  %v2952_v32 = vld [vmem:[#allocation7 + $0xcc] ss:$16 sps:$4 sm:$0xff]  }
  0x4a   :  { %207 = vmatpush1.bf16.msra.mxu0 %v2926_v6  ;;  %661 = vmatprep.subr.bf16.mxu1 %v2954_v16  ;;  %v2971_v28 = vld [vmem:[#allocation7 + $0x60] ss:$16 sps:$4 sm:$0xff]   ;;  %v2972_v29 = vld [vmem:[#allocation7 + $0x44] ss:$16 sps:$4 sm:$0xff]   ;;  %v2944_v31 = vld [vmem:[#allocation7 + $0xe8] ss:$16 sps:$4 sm:$0xff]  }
  0x4b   :  { %208 = vmatprep.subr.bf16.mxu0 %v2927_v7  ;;  %v2977_v33 = vld [vmem:[#allocation7 + $0x40] ss:$16 sps:$4 sm:$0xff]   ;;  %v2978_v34 = vld [vmem:[#allocation7 + $0x24] ss:$16 sps:$4 sm:$0xff]   ;;  %v2950_v35 = vld [vmem:[#allocation7 + $0xc8] ss:$16 sps:$4 sm:$0xff]  }
  0x4c   :  { %v2958_v36 = vld [vmem:[#allocation7 + $0xac] ss:$16 sps:$4 sm:$0xff]   ;;  %v2983_v37 = vld [vmem:[#allocation7 + $0x20] ss:$16 sps:$4 sm:$0xff]   ;;  %v2984_v38 = vld [vmem:[#allocation7 + $0x4] ss:$16 sps:$4 sm:$0xff]  }
  0x4d   :  { %662 = vmatpush1.bf16.msra.mxu1 %v2959_v19  ;;  %v2956_v39 = vld [vmem:[#allocation7 + $0xa8] ss:$16 sps:$4 sm:$0xff]   ;;  %v2964_v40 = vld [vmem:[#allocation7 + $0x8c] ss:$16 sps:$4 sm:$0xff]   ;;  %v2989_v41 = vld [vmem:[#allocation7] ss:$16 sps:$4 sm:$0xff]  }
  0x4e   :  { %209 = vmatpush1.bf16.msra.mxu0 %v2929_v8  ;;  %663 = vmatprep.subr.bf16.mxu1 %v2960_v20  ;;  %v2990_v42 = vld [vmem:[#allocation7 + $0x1e4] ss:$16 sps:$4 sm:$0xff]   ;;  %v2962_v43 = vld [vmem:[#allocation7 + $0x88] ss:$16 sps:$4 sm:$0xff]   ;;  %v2970_v44 = vld [vmem:[#allocation7 + $0x6c] ss:$16 sps:$4 sm:$0xff]  }
  0x4f   :  { %210 = vmatprep.subr.bf16.mxu0 %v2930_v10  ;;  %v2995_v45 = vld [vmem:[#allocation7 + $0x1e0] ss:$16 sps:$4 sm:$0xff]   ;;  %v2996_v46 = vld [vmem:[#allocation7 + $0x1c4] ss:$16 sps:$4 sm:$0xff]   ;;  %v2968_v47 = vld [vmem:[#allocation7 + $0x68] ss:$16 sps:$4 sm:$0xff]  }
  0x50   :  { %v2976_v48 = vld [vmem:[#allocation7 + $0x4c] ss:$16 sps:$4 sm:$0xff]   ;;  %v3001_v49 = vld [vmem:[#allocation7 + $0x1c0] ss:$16 sps:$4 sm:$0xff]   ;;  %v3002_v50 = vld [vmem:[#allocation7 + $0x1a4] ss:$16 sps:$4 sm:$0xff]  }
  0x51   :  { %664 = vmatpush1.bf16.msra.mxu1 %v2965_v23  ;;  %v2974_v51 = vld [vmem:[#allocation7 + $0x48] ss:$16 sps:$4 sm:$0xff]   ;;  %v3007_v52 = vld [vmem:[#allocation7 + $0x1a0] ss:$16 sps:$4 sm:$0xff]   ;;  %v2982_v53 = vld [vmem:[#allocation7 + $0x2c] ss:$16 sps:$4 sm:$0xff]  }
  0x52   :  { %211 = vmatpush1.bf16.msra.mxu0 %v2932_v13  ;;  %665 = vmatprep.subr.bf16.mxu1 %v2966_v24  ;;  %v3008_v54 = vld [vmem:[#allocation7 + $0x184] ss:$16 sps:$4 sm:$0xff]   ;;  %v2980_v55 = vld [vmem:[#allocation7 + $0x28] ss:$16 sps:$4 sm:$0xff]   ;;  %v3013_v56 = vld [vmem:[#allocation7 + $0x180] ss:$16 sps:$4 sm:$0xff]  }
  0x53   :  { %212 = vmatprep.subr.bf16.mxu0 %v2933_v14  ;;  %v2988_v57 = vld [vmem:[#allocation7 + $0xc] ss:$16 sps:$4 sm:$0xff]   ;;  %v3014_v58 = vld [vmem:[#allocation7 + $0x164] ss:$16 sps:$4 sm:$0xff]   ;;  %v2986_v59 = vld [vmem:[#allocation7 + $0x8] ss:$16 sps:$4 sm:$0xff]  }
  0x54   :  { %v3019_v60 = vld [vmem:[#allocation7 + $0x160] ss:$16 sps:$4 sm:$0xff]   ;;  %v2994_v61 = vld [vmem:[#allocation7 + $0x1ec] ss:$16 sps:$4 sm:$0xff]   ;;  %v3020_v62 = vld [vmem:[#allocation7 + $0x144] ss:$16 sps:$4 sm:$0xff]  }
  0x55   :  { %666 = vmatpush1.bf16.msra.mxu1 %v2971_v28  ;;  %v2992_v63 = vld [vmem:[#allocation7 + $0x1e8] ss:$16 sps:$4 sm:$0xff]   ;;  %v3000_v0 = vld [vmem:[#allocation7 + $0x1cc] ss:$16 sps:$4 sm:$0xff]   ;;  %v3025_v10 = vld [vmem:[#allocation7 + $0x140] ss:$16 sps:$4 sm:$0xff]  }
  0x56   :  { %213 = vmatpush1.bf16.msra.mxu0 %v2935_v17  ;;  %667 = vmatprep.subr.bf16.mxu1 %v2972_v29  ;;  %v2998_v1 = vld [vmem:[#allocation7 + $0x1c8] ss:$16 sps:$4 sm:$0xff]   ;;  %v3006_v2 = vld [vmem:[#allocation7 + $0x1ac] ss:$16 sps:$4 sm:$0xff]   ;;  %v3026_v11 = vld [vmem:[#allocation7 + $0x124] ss:$16 sps:$4 sm:$0xff]  }
  0x57   :  { %214 = vmatprep.subr.bf16.mxu0 %v2936_v18  ;;  %v3004_v3 = vld [vmem:[#allocation7 + $0x1a8] ss:$16 sps:$4 sm:$0xff]   ;;  %v3012_v4 = vld [vmem:[#allocation7 + $0x18c] ss:$16 sps:$4 sm:$0xff]   ;;  %v3031_v14 = vld [vmem:[#allocation7 + $0x120] ss:$16 sps:$4 sm:$0xff]  }
  0x58   :  { %v3010_v5 = vld [vmem:[#allocation7 + $0x188] ss:$16 sps:$4 sm:$0xff]   ;;  %v3018_v6 = vld [vmem:[#allocation7 + $0x16c] ss:$16 sps:$4 sm:$0xff]   ;;  %v3032_v15 = vld [vmem:[#allocation7 + $0x104] ss:$16 sps:$4 sm:$0xff]  }
  0x59   :  { %668 = vmatpush1.bf16.msra.mxu1 %v2977_v33  ;;  %v3016_v7 = vld [vmem:[#allocation7 + $0x168] ss:$16 sps:$4 sm:$0xff]   ;;  %v3024_v8 = vld [vmem:[#allocation7 + $0x14c] ss:$16 sps:$4 sm:$0xff]   ;;  %v3037_v18 = vld [vmem:[#allocation7 + $0x100] ss:$16 sps:$4 sm:$0xff]  }
  0x5a   :  { %215 = vmatpush1.bf16.msra.mxu0 %v2938_v21  ;;  %669 = vmatprep.subr.bf16.mxu1 %v2978_v34  ;;  %v3022_v9 = vld [vmem:[#allocation7 + $0x148] ss:$16 sps:$4 sm:$0xff]   ;;  %v3030_v12 = vld [vmem:[#allocation7 + $0x12c] ss:$16 sps:$4 sm:$0xff]   ;;  %v112_v21 = vlaneseq }
  0x5b   :  { %216 = vmatprep.subr.bf16.mxu0 %v2939_v22  ;;  %v3028_v13 = vld [vmem:[#allocation7 + $0x128] ss:$16 sps:$4 sm:$0xff]   ;;  %v3036_v16 = vld [vmem:[#allocation7 + $0x10c] ss:$16 sps:$4 sm:$0xff]  }
  0x5c   :  { %v3034_v17 = vld [vmem:[#allocation7 + $0x108] ss:$16 sps:$4 sm:$0xff]   ;;  %v3040_v19 = vld [vmem:[#allocation10 + $0x18c] ss:$28 sps:$4 sm:$0xff]   ;;  %v3568_v22 = vshrl.u32 %v112_v21, 7 }
  0x5d   :  { %670 = vmatpush1.bf16.msra.mxu1 %v2983_v37  ;;  %v3043_v20 = vld [vmem:[#allocation10 + $0x50c] ss:$28 sps:$4 sm:$0xff]   ;;  %v110_v24 = vld [vmem:[%s3639_s2] sm:$0x3]  ;;  %v3107_v21 = vld [vmem:[#allocation10 + $0x620] ss:$28 sps:$4 sm:$0xff]  }
  0x5e   :  { %217 = vmatpush1.bf16.msra.mxu0 %v2941_v25  ;;  %671 = vmatprep.subr.bf16.mxu1 %v2984_v38  ;;  %v3571_v23 = vsub.s32 0, %v3568_v22  ;;  %v3577_v25 = vsub.s32 1, %v3568_v22 }
  0x5f   :  { %698 = vmatprep.subr.bf16.mxu0 %v2946_v27 }
  0x60   :  { %v115_v26 = vrot.slane %v110_v24, %v3571_v23  ;;  %v119_v27 = vrot.slane %v110_v24, %v3577_v25  ;;  %v3112_v24 = vld [vmem:[#allocation10 + $0x26c] ss:$28 sps:$4 sm:$0xff]  }
  0x61   :  { %235 = vmatmul.mubr.bf16.vlgmr.msra.gmra.mxu0 %v93_v30  ;;  %672 = vmatpush1.bf16.msra.mxu1 %v2989_v41 }
  0x62   :  { %699 = vmatpush1.bf16.msra.mxu0 %v2944_v31  ;;  %673 = vmatprep.subr.bf16.mxu1 %v2990_v42  ;;  %v3046_v42 = vld [vmem:[#allocation10 + $0x154] ss:$28 sps:$4 sm:$0xff]  }
  0x63   :  { %700 = vmatprep.subr.bf16.mxu0 %v2952_v32 }
  0x65   :  { %674 = vmatpush2.bf16.msra.mxu1 %v2995_v45  ;;  %v3047_v45 = vld [vmem:[#allocation10 + $0x4d0] ss:$28 sps:$4 sm:$0xff]  }
  0x66   :  { %701 = vmatpush1.bf16.msra.mxu0 %v2950_v35  ;;  %675 = vmatprep.subr.bf16.mxu1 %v2996_v46  ;;  %v3052_v46 = vld [vmem:[#allocation10 + $0x11c] ss:$28 sps:$4 sm:$0xff]  }
  0x67   :  { %702 = vmatprep.subr.bf16.mxu0 %v2958_v36 }
  0x69   :  { %676 = vmatpush2.bf16.msra.mxu1 %v3001_v49  ;;  %v3053_v49 = vld [vmem:[#allocation10 + $0x498] ss:$28 sps:$4 sm:$0xff]  }
  0x6a   :  { %703 = vmatpush1.bf16.msra.mxu0 %v2956_v39  ;;  %677 = vmatprep.subr.bf16.mxu1 %v3002_v50  ;;  %v3038_v39 = vld [vmem:[#allocation10 + $0x188] ss:$28 sps:$4 sm:$0xff]  }
  0x6b   :  { %704 = vmatprep.subr.bf16.mxu0 %v2964_v40  ;;  %v3041_v40 = vld [vmem:[#allocation10 + $0x508] ss:$28 sps:$4 sm:$0xff]  }
  0x6c   :  { %v3058_v50 = vld [vmem:[#allocation10 + $0xe4] ss:$28 sps:$4 sm:$0xff]  }
  0x6d   :  { %678 = vmatpush2.bf16.msra.mxu1 %v3007_v52  ;;  %v3056_v52 = vld [vmem:[#allocation10 + $0xe0] ss:$28 sps:$4 sm:$0xff]  }
  0x6e   :  { %705 = vmatpush1.bf16.msra.mxu0 %v2962_v43  ;;  %679 = vmatprep.subr.bf16.mxu1 %v3008_v54  ;;  %v3049_v43 = vld [vmem:[#allocation10 + $0x4d4] ss:$28 sps:$4 sm:$0xff]   ;;  %v3064_v54 = vld [vmem:[#allocation10 + $0xac] ss:$28 sps:$4 sm:$0xff]  }
  0x6f   :  { %706 = vmatprep.subr.bf16.mxu0 %v2970_v44  ;;  %v3044_v44 = vld [vmem:[#allocation10 + $0x150] ss:$28 sps:$4 sm:$0xff]  }
  0x71   :  { %680 = vmatpush2.bf16.msra.mxu1 %v3013_v56  ;;  %v3062_v56 = vld [vmem:[#allocation10 + $0xa8] ss:$28 sps:$4 sm:$0xff]  }
  0x72   :  { %707 = vmatpush1.bf16.msra.mxu0 %v2968_v47  ;;  %681 = vmatprep.subr.bf16.mxu1 %v3014_v58  ;;  %v3055_v47 = vld [vmem:[#allocation10 + $0x49c] ss:$28 sps:$4 sm:$0xff]   ;;  %v3070_v58 = vld [vmem:[#allocation10 + $0x74] ss:$28 sps:$4 sm:$0xff]  }
  0x73   :  { %708 = vmatprep.subr.bf16.mxu0 %v2976_v48  ;;  %v3050_v48 = vld [vmem:[#allocation10 + $0x118] ss:$28 sps:$4 sm:$0xff]  }
  0x75   :  { %682 = vmatpush2.bf16.msra.mxu1 %v3019_v60  ;;  %v3068_v60 = vld [vmem:[#allocation10 + $0x70] ss:$28 sps:$4 sm:$0xff]  }
  0x76   :  { %709 = vmatpush1.bf16.msra.mxu0 %v2974_v51  ;;  %683 = vmatprep.subr.bf16.mxu1 %v3020_v62  ;;  %v3061_v51 = vld [vmem:[#allocation10 + $0x464] ss:$28 sps:$4 sm:$0xff]   ;;  %v3076_v62 = vld [vmem:[#allocation10 + $0x3c] ss:$28 sps:$4 sm:$0xff]  }
  0x77   :  { %710 = vmatprep.subr.bf16.mxu0 %v2982_v53  ;;  %v3059_v53 = vld [vmem:[#allocation10 + $0x460] ss:$28 sps:$4 sm:$0xff]  }
  0x79   :  { %684 = vmatpush2.bf16.msra.mxu1 %v3025_v10  ;;  %v3094_v10 = vld [vmem:[#allocation10 + $0x314] ss:$28 sps:$4 sm:$0xff]  }
  0x7a   :  { %711 = vmatpush1.bf16.msra.mxu0 %v2980_v55  ;;  %685 = vmatprep.subr.bf16.mxu1 %v3026_v11  ;;  %v3067_v55 = vld [vmem:[#allocation10 + $0x42c] ss:$28 sps:$4 sm:$0xff]   ;;  %v3097_v11 = vld [vmem:[#allocation10 + $0x694] ss:$28 sps:$4 sm:$0xff]  }
  0x7b   :  { %712 = vmatprep.subr.bf16.mxu0 %v2988_v57  ;;  %v3065_v57 = vld [vmem:[#allocation10 + $0x428] ss:$28 sps:$4 sm:$0xff]  }
  0x7d   :  { %686 = vmatpush2.bf16.msra.mxu1 %v3031_v14  ;;  %v3100_v14 = vld [vmem:[#allocation10 + $0x2dc] ss:$28 sps:$4 sm:$0xff]  }
  0x7e   :  { %713 = vmatpush1.bf16.msra.mxu0 %v2986_v59  ;;  %687 = vmatprep.subr.bf16.mxu1 %v3032_v15  ;;  %v3073_v59 = vld [vmem:[#allocation10 + $0x3f4] ss:$28 sps:$4 sm:$0xff]   ;;  %v3103_v15 = vld [vmem:[#allocation10 + $0x65c] ss:$28 sps:$4 sm:$0xff]  }
  0x7f   :  { %714 = vmatprep.subr.bf16.mxu0 %v2994_v61  ;;  %v3071_v61 = vld [vmem:[#allocation10 + $0x3f0] ss:$28 sps:$4 sm:$0xff]  }
  0x81   :  { %688 = vmatpush2.bf16.msra.mxu1 %v3037_v18  ;;  %v3106_v18 = vld [vmem:[#allocation10 + $0x2a4] ss:$28 sps:$4 sm:$0xff]  }
  0x82   :  { %715 = vmatpush2.bf16.msra.mxu0 %v2992_v63  ;;  %2200 = vmatprep.subr.bf16.mxu1 %v3040_v19  ;;  %v3079_v63 = vld [vmem:[#allocation10 + $0x3bc] ss:$28 sps:$4 sm:$0xff]   ;;  %v3109_v19 = vld [vmem:[#allocation10 + $0x624] ss:$28 sps:$4 sm:$0xff]  }
  0x83   :  { %716 = vmatprep.subr.bf16.mxu0 %v3000_v0  ;;  %v3074_v0 = vld [vmem:[#allocation10 + $0x38] ss:$28 sps:$4 sm:$0xff]  }
  0x86   :  { %717 = vmatpush2.bf16.msra.mxu0 %v2998_v1  ;;  %v3077_v1 = vld [vmem:[#allocation10 + $0x3b8] ss:$28 sps:$4 sm:$0xff]  }
  0x87   :  { %718 = vmatprep.subr.bf16.mxu0 %v3006_v2  ;;  %v3082_v2 = vld [vmem:[#allocation10 + $0x4] ss:$28 sps:$4 sm:$0xff]  }
  0x8a   :  { %719 = vmatpush2.bf16.msra.mxu0 %v3004_v3  ;;  %v3085_v3 = vld [vmem:[#allocation10 + $0x384] ss:$28 sps:$4 sm:$0xff]  }
  0x8b   :  { %720 = vmatprep.subr.bf16.mxu0 %v3012_v4  ;;  %v3080_v4 = vld [vmem:[#allocation10] ss:$28 sps:$4 sm:$0xff]  }
  0x8e   :  { %721 = vmatpush2.bf16.msra.mxu0 %v3010_v5  ;;  %v3083_v5 = vld [vmem:[#allocation10 + $0x380] ss:$28 sps:$4 sm:$0xff]  }
  0x8f   :  { %722 = vmatprep.subr.bf16.mxu0 %v3018_v6  ;;  %v3088_v6 = vld [vmem:[#allocation10 + $0x34c] ss:$28 sps:$4 sm:$0xff]  }
  0x92   :  { %723 = vmatpush2.bf16.msra.mxu0 %v3016_v7  ;;  %v3091_v7 = vld [vmem:[#allocation10 + $0x6cc] ss:$28 sps:$4 sm:$0xff]  }
  0x93   :  { %724 = vmatprep.subr.bf16.mxu0 %v3024_v8  ;;  %v3086_v8 = vld [vmem:[#allocation10 + $0x348] ss:$28 sps:$4 sm:$0xff]  }
  0x96   :  { %725 = vmatpush2.bf16.msra.mxu0 %v3022_v9  ;;  %v3089_v9 = vld [vmem:[#allocation10 + $0x6c8] ss:$28 sps:$4 sm:$0xff]  }
  0x97   :  { %726 = vmatprep.subr.bf16.mxu0 %v3030_v12  ;;  %v3092_v12 = vld [vmem:[#allocation10 + $0x310] ss:$28 sps:$4 sm:$0xff]  }
  0x9a   :  { %727 = vmatpush2.bf16.msra.mxu0 %v3028_v13  ;;  %v3095_v13 = vld [vmem:[#allocation10 + $0x690] ss:$28 sps:$4 sm:$0xff]  }
  0x9b   :  { %728 = vmatprep.subr.bf16.mxu0 %v3036_v16  ;;  %v3098_v16 = vld [vmem:[#allocation10 + $0x2d8] ss:$28 sps:$4 sm:$0xff]  }
  0x9e   :  { %729 = vmatpush2.bf16.msra.mxu0 %v3034_v17  ;;  %v3101_v17 = vld [vmem:[#allocation10 + $0x658] ss:$28 sps:$4 sm:$0xff]  }
  0x9f   :  { %2241 = vmatprep.subr.bf16.mxu0 %v3043_v20  ;;  %v3104_v20 = vld [vmem:[#allocation10 + $0x2a0] ss:$28 sps:$4 sm:$0xff]  }
 0x121   :  { %v236_v28 = vpop.f32.mrf.mxu0 }
 0x122   :  { %v237_v29 = vadd.f32 %v236_v28, %v115_v26  ;;  %v3115_v26 = vld [vmem:[#allocation10 + $0x5ec] ss:$28 sps:$4 sm:$0xff]  }
 0x123   :  { %v238_v30 = vpop.f32.mrf.mxu0  ;;  %v3113_v28 = vld [vmem:[#allocation10 + $0x5e8] ss:$28 sps:$4 sm:$0xff]  }
 0x124   :  { %vm243_vm0 = vcmp.gt.f32.partialorder %v237_v29, 0.0  ;;  %v245_v31 = vmul.f32 0.2, %v237_v29  ;;  %v239_v32 = vadd.f32 %v238_v30, %v119_v27  ;;  %v3110_v27 = vld [vmem:[#allocation10 + $0x268] ss:$28 sps:$4 sm:$0xff]  }
 0x125   :  { %v240_v33 = vpop.f32.mrf.mxu0  ;;  %v3121_v30 = vld [vmem:[#allocation10 + $0x5b4] ss:$28 sps:$4 sm:$0xff]  }
 0x126   :  { %v246_v34 = vmul.f32 0.2, %v239_v32  ;;  %vm244_vm1 = vcmp.gt.f32.partialorder %v239_v32, 0.0  ;;  %v247_v36 = vsel %vm243_vm0, %v237_v29, %v245_v31  ;;  %v3118_v29 = vld [vmem:[#allocation10 + $0x234] ss:$28 sps:$4 sm:$0xff]  }
 0x127   :  { %v241_v35 = vpop.f32.mrf.mxu0  ;;  %v249_v41 = vpack.c.bf16 %v247_v36, %v247_v36  ;;  %v3116_v31 = vld [vmem:[#allocation10 + $0x230] ss:$28 sps:$4 sm:$0xff]   ;;  %v3124_v33 = vld [vmem:[#allocation10 + $0x1fc] ss:$28 sps:$4 sm:$0xff]  }
 0x128   :  { %v248_v37 = vsel %vm244_vm1, %v239_v32, %v246_v34  ;;  %v3119_v32 = vld [vmem:[#allocation10 + $0x5b0] ss:$28 sps:$4 sm:$0xff]   ;;  %v3127_v34 = vld [vmem:[#allocation10 + $0x57c] ss:$28 sps:$4 sm:$0xff]  }
 0x129   :  { %v250_v38 = vpack.c.bf16 %v248_v37, %v248_v37  ;;  %v3122_v35 = vld [vmem:[#allocation10 + $0x1f8] ss:$28 sps:$4 sm:$0xff]   ;;  %v3130_v37 = vld [vmem:[#allocation10 + $0x1c4] ss:$28 sps:$4 sm:$0xff]  }
 0x12a   :  { %v3125_v36 = vld [vmem:[#allocation10 + $0x578] ss:$28 sps:$4 sm:$0xff]  }
 0x12b   :  { %689 = vmatprep.mubr.bf16.mxu1 %v250_v38  ;;  %730 = vmatprep.mubr.bf16.mxu0 %v250_v38  ;;  %v3133_v38 = vld [vmem:[#allocation10 + $0x544] ss:$28 sps:$4 sm:$0xff]  }
 0x12c   :  { %690 = vmatmul.mubr.bf16.vlgmr.msra.gmra.mxu1 %v249_v41  ;;  %731 = vmatmul.mubr.bf16.vlgmr.msra.gmra.mxu0 %v249_v41  ;;  %v3136_v41 = vld [vmem:[#allocation10 + $0x194] ss:$28 sps:$4 sm:$0xff]  }
 0x12d   :  { %2201 = vmatpush1.bf16.msra.mxu1 %v3038_v39  ;;  %2242 = vmatpush1.bf16.msra.mxu0 %v3041_v40  ;;  %v3128_v39 = vld [vmem:[#allocation10 + $0x1c0] ss:$28 sps:$4 sm:$0xff]  }
 0x12e   :  { %2202 = vmatprep.subr.bf16.mxu1 %v3046_v42  ;;  %2243 = vmatprep.subr.bf16.mxu0 %v3049_v43  ;;  %v3131_v40 = vld [vmem:[#allocation10 + $0x540] ss:$28 sps:$4 sm:$0xff]   ;;  %v3139_v42 = vld [vmem:[#allocation10 + $0x514] ss:$28 sps:$4 sm:$0xff]   ;;  %v327_v43 = vsub.s32 2, %v3568_v22 }
 0x131   :  { %2203 = vmatpush1.bf16.msra.mxu1 %v3044_v44  ;;  %2244 = vmatpush1.bf16.msra.mxu0 %v3047_v45  ;;  %v315_v44 = vld [vmem:[#allocation8] sm:$0xf]  ;;  %v331_v45 = vsub.s32 3, %v3568_v22 }
 0x132   :  { %2204 = vmatprep.subr.bf16.mxu1 %v3052_v46  ;;  %2245 = vmatprep.subr.bf16.mxu0 %v3055_v47  ;;  %v320_v46 = vrot.slane %v315_v44, %v3571_v23  ;;  %v328_v47 = vrot.slane %v315_v44, %v327_v43 }
 0x135   :  { %2205 = vmatpush1.bf16.msra.mxu1 %v3050_v48  ;;  %2246 = vmatpush1.bf16.msra.mxu0 %v3053_v49 }
 0x136   :  { %2206 = vmatprep.subr.bf16.mxu1 %v3058_v50  ;;  %2247 = vmatprep.subr.bf16.mxu0 %v3061_v51  ;;  %v324_v50 = vrot.slane %v315_v44, %v3577_v25  ;;  %v332_v51 = vrot.slane %v315_v44, %v331_v45  ;;  %v3184_v44 = vld [vmem:[#allocation10 + $0x354] ss:$28 sps:$4 sm:$0xff]  }
 0x139   :  { %2207 = vmatpush1.bf16.msra.mxu1 %v3056_v52  ;;  %2248 = vmatpush1.bf16.msra.mxu0 %v3059_v53 }
 0x13a   :  { %2208 = vmatprep.subr.bf16.mxu1 %v3064_v54  ;;  %2249 = vmatprep.subr.bf16.mxu0 %v3067_v55 }
 0x13d   :  { %2209 = vmatpush1.bf16.msra.mxu1 %v3062_v56  ;;  %2250 = vmatpush1.bf16.msra.mxu0 %v3065_v57 }
 0x13e   :  { %2210 = vmatprep.subr.bf16.mxu1 %v3070_v58  ;;  %2251 = vmatprep.subr.bf16.mxu0 %v3073_v59 }
 0x141   :  { %2211 = vmatpush1.bf16.msra.mxu1 %v3068_v60  ;;  %2252 = vmatpush1.bf16.msra.mxu0 %v3071_v61 }
 0x142   :  { %2212 = vmatprep.subr.bf16.mxu1 %v3076_v62  ;;  %2253 = vmatprep.subr.bf16.mxu0 %v3079_v63 }
 0x145   :  { %2213 = vmatpush1.bf16.msra.mxu1 %v3074_v0  ;;  %2254 = vmatpush1.bf16.msra.mxu0 %v3077_v1 }
 0x146   :  { %2214 = vmatprep.subr.bf16.mxu1 %v3082_v2  ;;  %2255 = vmatprep.subr.bf16.mxu0 %v3085_v3 }
 0x149   :  { %2215 = vmatpush1.bf16.msra.mxu1 %v3080_v4  ;;  %2256 = vmatpush1.bf16.msra.mxu0 %v3083_v5 }
 0x14a   :  { %2216 = vmatprep.subr.bf16.mxu1 %v3088_v6  ;;  %2257 = vmatprep.subr.bf16.mxu0 %v3091_v7  ;;  %v3134_v7 = vld [vmem:[#allocation10 + $0x190] ss:$28 sps:$4 sm:$0xff]  }
 0x14d   :  { %2217 = vmatpush2.bf16.msra.mxu1 %v3086_v8  ;;  %2258 = vmatpush2.bf16.msra.mxu0 %v3089_v9 }
 0x14e   :  { %2218 = vmatprep.subr.bf16.mxu1 %v3094_v10  ;;  %2259 = vmatprep.subr.bf16.mxu0 %v3097_v11  ;;  %v3137_v10 = vld [vmem:[#allocation10 + $0x510] ss:$28 sps:$4 sm:$0xff]  }
 0x151   :  { %2219 = vmatpush2.bf16.msra.mxu1 %v3092_v12  ;;  %2260 = vmatpush2.bf16.msra.mxu0 %v3095_v13  ;;  %v3142_v12 = vld [vmem:[#allocation10 + $0x15c] ss:$28 sps:$4 sm:$0xff]  }
 0x152   :  { %2220 = vmatprep.subr.bf16.mxu1 %v3100_v14  ;;  %2261 = vmatprep.subr.bf16.mxu0 %v3103_v15  ;;  %v3145_v13 = vld [vmem:[#allocation10 + $0x4dc] ss:$28 sps:$4 sm:$0xff]  }
 0x153   :  { %v3140_v14 = vld [vmem:[#allocation10 + $0x158] ss:$28 sps:$4 sm:$0xff]  }
 0x154   :  { %v3143_v15 = vld [vmem:[#allocation10 + $0x4d8] ss:$28 sps:$4 sm:$0xff]  }
 0x155   :  { %2221 = vmatpush2.bf16.msra.mxu1 %v3098_v16  ;;  %2262 = vmatpush2.bf16.msra.mxu0 %v3101_v17  ;;  %v3148_v16 = vld [vmem:[#allocation10 + $0x124] ss:$28 sps:$4 sm:$0xff]  }
 0x156   :  { %2222 = vmatprep.subr.bf16.mxu1 %v3106_v18  ;;  %2263 = vmatprep.subr.bf16.mxu0 %v3109_v19  ;;  %v3151_v17 = vld [vmem:[#allocation10 + $0x4a4] ss:$28 sps:$4 sm:$0xff]  }
 0x157   :  { %v3146_v18 = vld [vmem:[#allocation10 + $0x120] ss:$28 sps:$4 sm:$0xff]  }
 0x158   :  { %v3149_v19 = vld [vmem:[#allocation10 + $0x4a0] ss:$28 sps:$4 sm:$0xff]  }
 0x159   :  { %2223 = vmatpush2.bf16.msra.mxu1 %v3104_v20  ;;  %2264 = vmatpush2.bf16.msra.mxu0 %v3107_v21  ;;  %v3154_v20 = vld [vmem:[#allocation10 + $0xec] ss:$28 sps:$4 sm:$0xff]  }
 0x15a   :  { %2224 = vmatprep.subr.bf16.mxu1 %v3112_v24  ;;  %2265 = vmatprep.subr.bf16.mxu0 %v3115_v26  ;;  %v3157_v21 = vld [vmem:[#allocation10 + $0x46c] ss:$28 sps:$4 sm:$0xff]  }
 0x15b   :  { %v3152_v24 = vld [vmem:[#allocation10 + $0xe8] ss:$28 sps:$4 sm:$0xff]  }
 0x15c   :  { %v3155_v26 = vld [vmem:[#allocation10 + $0x468] ss:$28 sps:$4 sm:$0xff]  }
 0x15d   :  { %2225 = vmatpush2.bf16.msra.mxu1 %v3110_v27  ;;  %2266 = vmatpush2.bf16.msra.mxu0 %v3113_v28  ;;  %v3160_v27 = vld [vmem:[#allocation10 + $0xb4] ss:$28 sps:$4 sm:$0xff]  }
 0x15e   :  { %2226 = vmatprep.subr.bf16.mxu1 %v3118_v29  ;;  %2267 = vmatprep.subr.bf16.mxu0 %v3121_v30  ;;  %v3163_v28 = vld [vmem:[#allocation10 + $0x434] ss:$28 sps:$4 sm:$0xff]  }
 0x15f   :  { %v3158_v29 = vld [vmem:[#allocation10 + $0xb0] ss:$28 sps:$4 sm:$0xff]  }
 0x160   :  { %v3161_v30 = vld [vmem:[#allocation10 + $0x430] ss:$28 sps:$4 sm:$0xff]  }
 0x161   :  { %2227 = vmatpush2.bf16.msra.mxu1 %v3116_v31  ;;  %2268 = vmatpush2.bf16.msra.mxu0 %v3119_v32  ;;  %v3166_v31 = vld [vmem:[#allocation10 + $0x7c] ss:$28 sps:$4 sm:$0xff]  }
 0x162   :  { %2228 = vmatprep.subr.bf16.mxu1 %v3124_v33  ;;  %2269 = vmatprep.subr.bf16.mxu0 %v3127_v34  ;;  %v3169_v32 = vld [vmem:[#allocation10 + $0x3fc] ss:$28 sps:$4 sm:$0xff]  }
 0x163   :  { %v3164_v33 = vld [vmem:[#allocation10 + $0x78] ss:$28 sps:$4 sm:$0xff]  }
 0x164   :  { %v3167_v34 = vld [vmem:[#allocation10 + $0x3f8] ss:$28 sps:$4 sm:$0xff]  }
 0x165   :  { %2229 = vmatpush2.bf16.msra.mxu1 %v3122_v35  ;;  %2270 = vmatpush2.bf16.msra.mxu0 %v3125_v36  ;;  %v3172_v35 = vld [vmem:[#allocation10 + $0x44] ss:$28 sps:$4 sm:$0xff]  }
 0x166   :  { %2230 = vmatprep.subr.bf16.mxu1 %v3130_v37  ;;  %2271 = vmatprep.subr.bf16.mxu0 %v3133_v38  ;;  %v3175_v36 = vld [vmem:[#allocation10 + $0x3c4] ss:$28 sps:$4 sm:$0xff]  }
 0x167   :  { %v3170_v37 = vld [vmem:[#allocation10 + $0x40] ss:$28 sps:$4 sm:$0xff]  }
 0x168   :  { %v3173_v38 = vld [vmem:[#allocation10 + $0x3c0] ss:$28 sps:$4 sm:$0xff]  }
 0x169   :  { %2231 = vmatpush2.bf16.msra.mxu1 %v3128_v39  ;;  %2272 = vmatpush2.bf16.msra.mxu0 %v3131_v40  ;;  %v3178_v39 = vld [vmem:[#allocation10 + $0xc] ss:$28 sps:$4 sm:$0xff]  }
 0x16a   :  { %2282 = vmatprep.subr.bf16.mxu1 %v3136_v41  ;;  %2323 = vmatprep.subr.bf16.mxu0 %v3139_v42  ;;  %v3181_v40 = vld [vmem:[#allocation10 + $0x38c] ss:$28 sps:$4 sm:$0xff]  }
 0x16b   :  { %v3176_v41 = vld [vmem:[#allocation10 + $0x8] ss:$28 sps:$4 sm:$0xff]  }
 0x16c   :  { %v3179_v42 = vld [vmem:[#allocation10 + $0x388] ss:$28 sps:$4 sm:$0xff]  }
 0x1ec   :  { %v691_v48 = vpop.f32.mrf.mxu1  ;;  %v732_v49 = vpop.f32.mrf.mxu0 }
 0x1ed   :  { %v692_v52 = vadd.f32 %v691_v48, %v320_v46  ;;  %v733_v53 = vadd.f32 %v732_v49, %v328_v47  ;;  %v3187_v46 = vld [vmem:[#allocation10 + $0x6d4] ss:$28 sps:$4 sm:$0xff]   ;;  %v3190_v49 = vld [vmem:[#allocation10 + $0x31c] ss:$28 sps:$4 sm:$0xff]  }
 0x1ee   :  { %v693_v54 = vpop.f32.mrf.mxu1  ;;  %v734_v55 = vpop.f32.mrf.mxu0  ;;  %v3182_v47 = vld [vmem:[#allocation10 + $0x350] ss:$28 sps:$4 sm:$0xff]  }
 0x1ef   :  { %v743_v56 = vmul.f32 0.2, %v692_v52  ;;  %vm739_vm2 = vcmp.gt.f32.partialorder %v692_v52, 0.0  ;;  %v745_v57 = vmul.f32 0.2, %v733_v53  ;;  %v694_v58 = vadd.f32 %v693_v54, %v324_v50 }
 0x1f0   :  { %v735_v59 = vadd.f32 %v734_v55, %v332_v51  ;;  %v695_v60 = vpop.f32.mrf.mxu1  ;;  %v736_v61 = vpop.f32.mrf.mxu0  ;;  %vm741_vm3 = vcmp.gt.f32.partialorder %v733_v53, 0.0  ;;  %v3185_v48 = vld [vmem:[#allocation10 + $0x6d0] ss:$28 sps:$4 sm:$0xff]   ;;  %v3193_v50 = vld [vmem:[#allocation10 + $0x69c] ss:$28 sps:$4 sm:$0xff]  }
 0x1f1   :  { %vm740_vm4 = vcmp.gt.f32.partialorder %v694_v58, 0.0  ;;  %v744_v62 = vmul.f32 0.2, %v694_v58  ;;  %v747_v1 = vsel %vm739_vm2, %v692_v52, %v743_v56  ;;  %v749_v3 = vsel %vm741_vm3, %v733_v53, %v745_v57  ;;  %v3188_v51 = vld [vmem:[#allocation10 + $0x318] ss:$28 sps:$4 sm:$0xff]  }
 0x1f2   :  { %v696_v63 = vpop.f32.mrf.mxu1  ;;  %v737_v0 = vpop.f32.mrf.mxu0  ;;  %vm742_vm5 = vcmp.gt.f32.partialorder %v735_v59, 0.0  ;;  %v746_v2 = vmul.f32 0.2, %v735_v59  ;;  %v3591_v8 = vpack.c.bf16 %v747_v1, %v747_v1  ;;  %v3595_v11 = vpack.c.bf16 %v749_v3, %v749_v3  ;;  %v3191_v52 = vld [vmem:[#allocation10 + $0x698] ss:$28 sps:$4 sm:$0xff]  }
 0x1f3   :  { %v748_v4 = vsel %vm740_vm4, %v694_v58, %v744_v62  ;;  %v3196_v53 = vld [vmem:[#allocation10 + $0x2e4] ss:$28 sps:$4 sm:$0xff]   ;;  %v3202_v57 = vld [vmem:[#allocation10 + $0x2ac] ss:$28 sps:$4 sm:$0xff]   ;;  %v3208_v61 = vld [vmem:[#allocation10 + $0x274] ss:$28 sps:$4 sm:$0xff]  }
 0x1f4   :  { %v3589_v5 = vpack.c.bf16 %v748_v4, %v748_v4  ;;  %v750_v6 = vsel %vm742_vm5, %v735_v59, %v746_v2  ;;  %v3199_v54 = vld [vmem:[#allocation10 + $0x664] ss:$28 sps:$4 sm:$0xff]   ;;  %v3205_v58 = vld [vmem:[#allocation10 + $0x62c] ss:$28 sps:$4 sm:$0xff]   ;;  %v3211_v62 = vld [vmem:[#allocation10 + $0x5f4] ss:$28 sps:$4 sm:$0xff]  }
 0x1f5   :  { %v3593_v9 = vpack.c.bf16 %v750_v6, %v750_v6  ;;  %v3194_v55 = vld [vmem:[#allocation10 + $0x2e0] ss:$28 sps:$4 sm:$0xff]   ;;  %v3200_v59 = vld [vmem:[#allocation10 + $0x2a8] ss:$28 sps:$4 sm:$0xff]   ;;  %v3206_v63 = vld [vmem:[#allocation10 + $0x270] ss:$28 sps:$4 sm:$0xff]  }
 0x1f6   :  { %2232 = vmatprep.mubr.bf16.mxu1 %v3589_v5  ;;  %v3197_v56 = vld [vmem:[#allocation10 + $0x660] ss:$28 sps:$4 sm:$0xff]   ;;  %v3203_v60 = vld [vmem:[#allocation10 + $0x628] ss:$28 sps:$4 sm:$0xff]   ;;  %v3209_v0 = vld [vmem:[#allocation10 + $0x5f0] ss:$28 sps:$4 sm:$0xff]  }
 0x1f7   :  { %2273 = vmatprep.mubr.bf16.mxu0 %v3593_v9  ;;  %2233 = vmatmul.mubr.bf16.vlgmr.msra.gmra.mxu1 %v3591_v8  ;;  %v3214_v1 = vld [vmem:[#allocation10 + $0x23c] ss:$28 sps:$4 sm:$0xff]   ;;  %v3220_v6 = vld [vmem:[#allocation10 + $0x204] ss:$28 sps:$4 sm:$0xff]  }
 0x1f8   :  { %2274 = vmatmul.mubr.bf16.vlgmr.msra.gmra.mxu0 %v3595_v11  ;;  %2283 = vmatpush1.bf16.msra.mxu1 %v3134_v7  ;;  %v3217_v2 = vld [vmem:[#allocation10 + $0x5bc] ss:$28 sps:$4 sm:$0xff]   ;;  %v3223_v7 = vld [vmem:[#allocation10 + $0x584] ss:$28 sps:$4 sm:$0xff]  }
 0x1f9   :  { %2324 = vmatpush1.bf16.msra.mxu0 %v3137_v10  ;;  %2314 = vmatprep.mubr.bf16.mxu1 %v3589_v5  ;;  %v3212_v3 = vld [vmem:[#allocation10 + $0x238] ss:$28 sps:$4 sm:$0xff]   ;;  %v3218_v10 = vld [vmem:[#allocation10 + $0x200] ss:$28 sps:$4 sm:$0xff]  }
 0x1fa   :  { %2355 = vmatprep.mubr.bf16.mxu0 %v3593_v9  ;;  %2284 = vmatprep.subr.bf16.mxu1 %v3142_v12  ;;  %v3215_v4 = vld [vmem:[#allocation10 + $0x5b8] ss:$28 sps:$4 sm:$0xff]   ;;  %v3221_v12 = vld [vmem:[#allocation10 + $0x580] ss:$28 sps:$4 sm:$0xff]  }
 0x1fb   :  { %2325 = vmatprep.subr.bf16.mxu0 %v3145_v13  ;;  %v3226_v13 = vld [vmem:[#allocation10 + $0x1cc] ss:$28 sps:$4 sm:$0xff]  }
 0x1fc   :  { %2285 = vmatpush1.bf16.msra.mxu1 %v3140_v14  ;;  %v3229_v14 = vld [vmem:[#allocation10 + $0x54c] ss:$28 sps:$4 sm:$0xff]  }
 0x1fd   :  { %2326 = vmatpush1.bf16.msra.mxu0 %v3143_v15  ;;  %2286 = vmatprep.subr.bf16.mxu1 %v3148_v16  ;;  %v3224_v15 = vld [vmem:[#allocation10 + $0x1c8] ss:$28 sps:$4 sm:$0xff]  }
 0x1fe   :  { %2327 = vmatprep.subr.bf16.mxu0 %v3151_v17  ;;  %v3227_v16 = vld [vmem:[#allocation10 + $0x548] ss:$28 sps:$4 sm:$0xff]   ;;  %v3232_v17 = vld [vmem:[#allocation10 + $0x19c] ss:$28 sps:$4 sm:$0xff]  }
 0x200   :  { %2287 = vmatpush1.bf16.msra.mxu1 %v3146_v18  ;;  %v3235_v18 = vld [vmem:[#allocation10 + $0x51c] ss:$28 sps:$4 sm:$0xff]  }
 0x201   :  { %2328 = vmatpush1.bf16.msra.mxu0 %v3149_v19  ;;  %2288 = vmatprep.subr.bf16.mxu1 %v3154_v20  ;;  %v3230_v19 = vld [vmem:[#allocation10 + $0x198] ss:$28 sps:$4 sm:$0xff]  }
 0x202   :  { %2329 = vmatprep.subr.bf16.mxu0 %v3157_v21  ;;  %v3233_v20 = vld [vmem:[#allocation10 + $0x518] ss:$28 sps:$4 sm:$0xff]   ;;  %v3238_v21 = vld [vmem:[#allocation10 + $0x164] ss:$28 sps:$4 sm:$0xff]  }
 0x204   :  { %2289 = vmatpush1.bf16.msra.mxu1 %v3152_v24  ;;  %v3241_v24 = vld [vmem:[#allocation10 + $0x4e4] ss:$28 sps:$4 sm:$0xff]  }
 0x205   :  { %2330 = vmatpush1.bf16.msra.mxu0 %v3155_v26  ;;  %2290 = vmatprep.subr.bf16.mxu1 %v3160_v27  ;;  %v3236_v26 = vld [vmem:[#allocation10 + $0x160] ss:$28 sps:$4 sm:$0xff]  }
 0x206   :  { %2331 = vmatprep.subr.bf16.mxu0 %v3163_v28  ;;  %v3239_v27 = vld [vmem:[#allocation10 + $0x4e0] ss:$28 sps:$4 sm:$0xff]   ;;  %v3244_v28 = vld [vmem:[#allocation10 + $0x12c] ss:$28 sps:$4 sm:$0xff]  }
 0x208   :  { %2291 = vmatpush1.bf16.msra.mxu1 %v3158_v29  ;;  %v3247_v29 = vld [vmem:[#allocation10 + $0x4ac] ss:$28 sps:$4 sm:$0xff]  }
 0x209   :  { %2332 = vmatpush1.bf16.msra.mxu0 %v3161_v30  ;;  %2292 = vmatprep.subr.bf16.mxu1 %v3166_v31  ;;  %v3242_v30 = vld [vmem:[#allocation10 + $0x128] ss:$28 sps:$4 sm:$0xff]  }
 0x20a   :  { %2333 = vmatprep.subr.bf16.mxu0 %v3169_v32  ;;  %v3245_v31 = vld [vmem:[#allocation10 + $0x4a8] ss:$28 sps:$4 sm:$0xff]   ;;  %v3250_v32 = vld [vmem:[#allocation10 + $0xf4] ss:$28 sps:$4 sm:$0xff]  }
 0x20c   :  { %2293 = vmatpush1.bf16.msra.mxu1 %v3164_v33  ;;  %v3253_v33 = vld [vmem:[#allocation10 + $0x474] ss:$28 sps:$4 sm:$0xff]  }
 0x20d   :  { %2334 = vmatpush1.bf16.msra.mxu0 %v3167_v34  ;;  %2294 = vmatprep.subr.bf16.mxu1 %v3172_v35  ;;  %v3248_v34 = vld [vmem:[#allocation10 + $0xf0] ss:$28 sps:$4 sm:$0xff]  }
 0x20e   :  { %2335 = vmatprep.subr.bf16.mxu0 %v3175_v36  ;;  %v3251_v35 = vld [vmem:[#allocation10 + $0x470] ss:$28 sps:$4 sm:$0xff]   ;;  %v3256_v36 = vld [vmem:[#allocation10 + $0xbc] ss:$28 sps:$4 sm:$0xff]  }
 0x210   :  { %2295 = vmatpush1.bf16.msra.mxu1 %v3170_v37  ;;  %v3259_v37 = vld [vmem:[#allocation10 + $0x43c] ss:$28 sps:$4 sm:$0xff]  }
 0x211   :  { %2336 = vmatpush1.bf16.msra.mxu0 %v3173_v38  ;;  %2296 = vmatprep.subr.bf16.mxu1 %v3178_v39  ;;  %v3254_v38 = vld [vmem:[#allocation10 + $0xb8] ss:$28 sps:$4 sm:$0xff]  }
 0x212   :  { %2337 = vmatprep.subr.bf16.mxu0 %v3181_v40  ;;  %v3257_v39 = vld [vmem:[#allocation10 + $0x438] ss:$28 sps:$4 sm:$0xff]   ;;  %v3262_v40 = vld [vmem:[#allocation10 + $0x84] ss:$28 sps:$4 sm:$0xff]  }
 0x214   :  { %2297 = vmatpush1.bf16.msra.mxu1 %v3176_v41  ;;  %v3265_v41 = vld [vmem:[#allocation10 + $0x404] ss:$28 sps:$4 sm:$0xff]  }
 0x215   :  { %2338 = vmatpush1.bf16.msra.mxu0 %v3179_v42  ;;  %2298 = vmatprep.subr.bf16.mxu1 %v3184_v44  ;;  %v3260_v42 = vld [vmem:[#allocation10 + $0x80] ss:$28 sps:$4 sm:$0xff]  }
 0x216   :  { %2339 = vmatprep.subr.bf16.mxu0 %v3187_v46  ;;  %v3263_v44 = vld [vmem:[#allocation10 + $0x400] ss:$28 sps:$4 sm:$0xff]   ;;  %v3268_v46 = vld [vmem:[#allocation10 + $0x4c] ss:$28 sps:$4 sm:$0xff]  }
 0x218   :  { %2299 = vmatpush2.bf16.msra.mxu1 %v3182_v47  ;;  %v3271_v47 = vld [vmem:[#allocation10 + $0x3cc] ss:$28 sps:$4 sm:$0xff]  }
 0x219   :  { %2340 = vmatpush2.bf16.msra.mxu0 %v3185_v48  ;;  %2300 = vmatprep.subr.bf16.mxu1 %v3190_v49  ;;  %v3266_v48 = vld [vmem:[#allocation10 + $0x48] ss:$28 sps:$4 sm:$0xff]  }
 0x21a   :  { %2341 = vmatprep.subr.bf16.mxu0 %v3193_v50  ;;  %v3269_v49 = vld [vmem:[#allocation10 + $0x3c8] ss:$28 sps:$4 sm:$0xff]   ;;  %v3274_v50 = vld [vmem:[#allocation10 + $0x14] ss:$28 sps:$4 sm:$0xff]  }
 0x21c   :  { %2301 = vmatpush2.bf16.msra.mxu1 %v3188_v51  ;;  %v3277_v51 = vld [vmem:[#allocation10 + $0x394] ss:$28 sps:$4 sm:$0xff]  }
 0x21d   :  { %2342 = vmatpush2.bf16.msra.mxu0 %v3191_v52  ;;  %2302 = vmatprep.subr.bf16.mxu1 %v3196_v53  ;;  %v3272_v52 = vld [vmem:[#allocation10 + $0x10] ss:$28 sps:$4 sm:$0xff]  }
 0x21e   :  { %2343 = vmatprep.subr.bf16.mxu0 %v3199_v54  ;;  %v3275_v53 = vld [vmem:[#allocation10 + $0x390] ss:$28 sps:$4 sm:$0xff]   ;;  %v3280_v54 = vld [vmem:[#allocation10 + $0x35c] ss:$28 sps:$4 sm:$0xff]  }
 0x220   :  { %2303 = vmatpush2.bf16.msra.mxu1 %v3194_v55  ;;  %v3283_v55 = vld [vmem:[#allocation10 + $0x6dc] ss:$28 sps:$4 sm:$0xff]  }
 0x221   :  { %2344 = vmatpush2.bf16.msra.mxu0 %v3197_v56  ;;  %2304 = vmatprep.subr.bf16.mxu1 %v3202_v57  ;;  %v3278_v56 = vld [vmem:[#allocation10 + $0x358] ss:$28 sps:$4 sm:$0xff]  }
 0x222   :  { %2345 = vmatprep.subr.bf16.mxu0 %v3205_v58  ;;  %v3281_v57 = vld [vmem:[#allocation10 + $0x6d8] ss:$28 sps:$4 sm:$0xff]   ;;  %v3286_v58 = vld [vmem:[#allocation10 + $0x324] ss:$28 sps:$4 sm:$0xff]  }
 0x224   :  { %2305 = vmatpush2.bf16.msra.mxu1 %v3200_v59  ;;  %v3289_v59 = vld [vmem:[#allocation10 + $0x6a4] ss:$28 sps:$4 sm:$0xff]  }
 0x225   :  { %2346 = vmatpush2.bf16.msra.mxu0 %v3203_v60  ;;  %2306 = vmatprep.subr.bf16.mxu1 %v3208_v61  ;;  %v3284_v60 = vld [vmem:[#allocation10 + $0x320] ss:$28 sps:$4 sm:$0xff]  }
 0x226   :  { %2347 = vmatprep.subr.bf16.mxu0 %v3211_v62  ;;  %v3287_v61 = vld [vmem:[#allocation10 + $0x6a0] ss:$28 sps:$4 sm:$0xff]   ;;  %v3292_v62 = vld [vmem:[#allocation10 + $0x2ec] ss:$28 sps:$4 sm:$0xff]  }
 0x228   :  { %2307 = vmatpush2.bf16.msra.mxu1 %v3206_v63  ;;  %v3295_v63 = vld [vmem:[#allocation10 + $0x66c] ss:$28 sps:$4 sm:$0xff]  }
 0x229   :  { %2348 = vmatpush2.bf16.msra.mxu0 %v3209_v0  ;;  %2308 = vmatprep.subr.bf16.mxu1 %v3214_v1  ;;  %v3290_v0 = vld [vmem:[#allocation10 + $0x2e8] ss:$28 sps:$4 sm:$0xff]  }
 0x22a   :  { %2349 = vmatprep.subr.bf16.mxu0 %v3217_v2  ;;  %v3293_v1 = vld [vmem:[#allocation10 + $0x668] ss:$28 sps:$4 sm:$0xff]   ;;  %v3298_v2 = vld [vmem:[#allocation10 + $0x2b4] ss:$28 sps:$4 sm:$0xff]  }
 0x22c   :  { %2309 = vmatpush2.bf16.msra.mxu1 %v3212_v3  ;;  %v3301_v3 = vld [vmem:[#allocation10 + $0x634] ss:$28 sps:$4 sm:$0xff]  }
 0x22d   :  { %2350 = vmatpush2.bf16.msra.mxu0 %v3215_v4  ;;  %2310 = vmatprep.subr.bf16.mxu1 %v3220_v6  ;;  %v3296_v4 = vld [vmem:[#allocation10 + $0x2b0] ss:$28 sps:$4 sm:$0xff]  }
 0x22e   :  { %2351 = vmatprep.subr.bf16.mxu0 %v3223_v7  ;;  %v3299_v6 = vld [vmem:[#allocation10 + $0x630] ss:$28 sps:$4 sm:$0xff]   ;;  %v3304_v7 = vld [vmem:[#allocation10 + $0x27c] ss:$28 sps:$4 sm:$0xff]  }
 0x230   :  { %2311 = vmatpush2.bf16.msra.mxu1 %v3218_v10  ;;  %v3307_v10 = vld [vmem:[#allocation10 + $0x5fc] ss:$28 sps:$4 sm:$0xff]  }
 0x231   :  { %2352 = vmatpush2.bf16.msra.mxu0 %v3221_v12  ;;  %2312 = vmatprep.subr.bf16.mxu1 %v3226_v13  ;;  %v3302_v12 = vld [vmem:[#allocation10 + $0x278] ss:$28 sps:$4 sm:$0xff]  }
 0x232   :  { %2353 = vmatprep.subr.bf16.mxu0 %v3229_v14  ;;  %v3305_v13 = vld [vmem:[#allocation10 + $0x5f8] ss:$28 sps:$4 sm:$0xff]   ;;  %v3310_v14 = vld [vmem:[#allocation10 + $0x244] ss:$28 sps:$4 sm:$0xff]  }
 0x234   :  { %2313 = vmatpush2.bf16.msra.mxu1 %v3224_v15  ;;  %v3313_v15 = vld [vmem:[#allocation10 + $0x5c4] ss:$28 sps:$4 sm:$0xff]  }
 0x235   :  { %2354 = vmatpush2.bf16.msra.mxu0 %v3227_v16  ;;  %2364 = vmatprep.subr.bf16.mxu1 %v3232_v17  ;;  %v3308_v16 = vld [vmem:[#allocation10 + $0x240] ss:$28 sps:$4 sm:$0xff]  }
 0x236   :  { %2405 = vmatprep.subr.bf16.mxu0 %v3235_v18  ;;  %v3311_v17 = vld [vmem:[#allocation10 + $0x5c0] ss:$28 sps:$4 sm:$0xff]   ;;  %v3316_v18 = vld [vmem:[#allocation10 + $0x20c] ss:$28 sps:$4 sm:$0xff]  }
 0x237   :  { %2315 = vmatmul.mubr.bf16.vlgmr.msra.gmra.mxu1 %v3591_v8 }
 0x238   :  { %2356 = vmatmul.mubr.bf16.vlgmr.msra.gmra.mxu0 %v3595_v11  ;;  %2365 = vmatpush1.bf16.msra.mxu1 %v3230_v19  ;;  %v3319_v19 = vld [vmem:[#allocation10 + $0x58c] ss:$28 sps:$4 sm:$0xff]  }
 0x239   :  { %2396 = vmatprep.mubr.bf16.mxu1 %v3589_v5  ;;  %2406 = vmatpush1.bf16.msra.mxu0 %v3233_v20  ;;  %v3314_v20 = vld [vmem:[#allocation10 + $0x208] ss:$28 sps:$4 sm:$0xff]  }
 0x23a   :  { %2437 = vmatprep.mubr.bf16.mxu0 %v3593_v9  ;;  %2366 = vmatprep.subr.bf16.mxu1 %v3238_v21  ;;  %v3317_v21 = vld [vmem:[#allocation10 + $0x588] ss:$28 sps:$4 sm:$0xff]  }
 0x23b   :  { %2407 = vmatprep.subr.bf16.mxu0 %v3241_v24  ;;  %v3322_v24 = vld [vmem:[#allocation10 + $0x1d4] ss:$28 sps:$4 sm:$0xff]  }
 0x23c   :  { %2367 = vmatpush1.bf16.msra.mxu1 %v3236_v26  ;;  %v3325_v26 = vld [vmem:[#allocation10 + $0x554] ss:$28 sps:$4 sm:$0xff]  }
 0x23d   :  { %2408 = vmatpush1.bf16.msra.mxu0 %v3239_v27  ;;  %2368 = vmatprep.subr.bf16.mxu1 %v3244_v28  ;;  %v3320_v27 = vld [vmem:[#allocation10 + $0x1d0] ss:$28 sps:$4 sm:$0xff]  }
 0x23e   :  { %2409 = vmatprep.subr.bf16.mxu0 %v3247_v29  ;;  %v3323_v28 = vld [vmem:[#allocation10 + $0x550] ss:$28 sps:$4 sm:$0xff]   ;;  %v3326_v29 = vld [vmem:[#allocation10 + $0x360] ss:$28 sps:$4 sm:$0xff]  }
 0x240   :  { %2369 = vmatpush1.bf16.msra.mxu1 %v3242_v30  ;;  %v3327_v30 = vld [vmem:[#allocation10 + $0x6e0] ss:$28 sps:$4 sm:$0xff]  }
 0x241   :  { %2410 = vmatpush1.bf16.msra.mxu0 %v3245_v31  ;;  %2370 = vmatprep.subr.bf16.mxu1 %v3250_v32  ;;  %v3328_v31 = vld [vmem:[#allocation10 + $0x1a0] ss:$28 sps:$4 sm:$0xff]  }
 0x242   :  { %2411 = vmatprep.subr.bf16.mxu0 %v3253_v33  ;;  %v3329_v32 = vld [vmem:[#allocation10 + $0x520] ss:$28 sps:$4 sm:$0xff]   ;;  %v3330_v33 = vld [vmem:[#allocation10 + $0x328] ss:$28 sps:$4 sm:$0xff]  }
 0x244   :  { %2371 = vmatpush1.bf16.msra.mxu1 %v3248_v34  ;;  %v3331_v34 = vld [vmem:[#allocation10 + $0x6a8] ss:$28 sps:$4 sm:$0xff]  }
 0x245   :  { %2412 = vmatpush1.bf16.msra.mxu0 %v3251_v35  ;;  %2372 = vmatprep.subr.bf16.mxu1 %v3256_v36  ;;  %v3332_v35 = vld [vmem:[#allocation10 + $0x168] ss:$28 sps:$4 sm:$0xff]  }
 0x246   :  { %2413 = vmatprep.subr.bf16.mxu0 %v3259_v37  ;;  %v3333_v36 = vld [vmem:[#allocation10 + $0x4e8] ss:$28 sps:$4 sm:$0xff]   ;;  %v3334_v37 = vld [vmem:[#allocation10 + $0x2f0] ss:$28 sps:$4 sm:$0xff]  }
 0x248   :  { %2373 = vmatpush1.bf16.msra.mxu1 %v3254_v38  ;;  %v3335_v38 = vld [vmem:[#allocation10 + $0x670] ss:$28 sps:$4 sm:$0xff]  }
 0x249   :  { %2414 = vmatpush1.bf16.msra.mxu0 %v3257_v39  ;;  %2374 = vmatprep.subr.bf16.mxu1 %v3262_v40  ;;  %v3336_v39 = vld [vmem:[#allocation10 + $0x130] ss:$28 sps:$4 sm:$0xff]  }
 0x24a   :  { %2415 = vmatprep.subr.bf16.mxu0 %v3265_v41  ;;  %v3337_v40 = vld [vmem:[#allocation10 + $0x4b0] ss:$28 sps:$4 sm:$0xff]   ;;  %v3338_v41 = vld [vmem:[#allocation10 + $0x2b8] ss:$28 sps:$4 sm:$0xff]  }
 0x24c   :  { %2375 = vmatpush1.bf16.msra.mxu1 %v3260_v42  ;;  %v3339_v42 = vld [vmem:[#allocation10 + $0x638] ss:$28 sps:$4 sm:$0xff]  }
 0x24d   :  { %2416 = vmatpush1.bf16.msra.mxu0 %v3263_v44  ;;  %2376 = vmatprep.subr.bf16.mxu1 %v3268_v46  ;;  %v3340_v44 = vld [vmem:[#allocation10 + $0xf8] ss:$28 sps:$4 sm:$0xff]   ;;  %v3342_v46 = vld [vmem:[#allocation10 + $0x280] ss:$28 sps:$4 sm:$0xff]  }
 0x24e   :  { %2417 = vmatprep.subr.bf16.mxu0 %v3271_v47  ;;  %v3343_v47 = vld [vmem:[#allocation10 + $0x600] ss:$28 sps:$4 sm:$0xff]  }
 0x250   :  { %2377 = vmatpush1.bf16.msra.mxu1 %v3266_v48  ;;  %v3345_v48 = vld [vmem:[#allocation10 + $0x440] ss:$28 sps:$4 sm:$0xff]  }
 0x251   :  { %2418 = vmatpush1.bf16.msra.mxu0 %v3269_v49  ;;  %2378 = vmatprep.subr.bf16.mxu1 %v3274_v50  ;;  %v3346_v49 = vld [vmem:[#allocation10 + $0x248] ss:$28 sps:$4 sm:$0xff]  }
 0x252   :  { %2419 = vmatprep.subr.bf16.mxu0 %v3277_v51  ;;  %v3347_v50 = vld [vmem:[#allocation10 + $0x5c8] ss:$28 sps:$4 sm:$0xff]  }
 0x253   :  { %v3348_v51 = vld [vmem:[#allocation10 + $0x88] ss:$28 sps:$4 sm:$0xff]  }
 0x254   :  { %2379 = vmatpush1.bf16.msra.mxu1 %v3272_v52  ;;  %v3349_v52 = vld [vmem:[#allocation10 + $0x408] ss:$28 sps:$4 sm:$0xff]  }
 0x255   :  { %2420 = vmatpush1.bf16.msra.mxu0 %v3275_v53  ;;  %2380 = vmatprep.subr.bf16.mxu1 %v3280_v54  ;;  %v3350_v53 = vld [vmem:[#allocation10 + $0x210] ss:$28 sps:$4 sm:$0xff]  }
 0x256   :  { %2421 = vmatprep.subr.bf16.mxu0 %v3283_v55  ;;  %v3351_v54 = vld [vmem:[#allocation10 + $0x590] ss:$28 sps:$4 sm:$0xff]  }
 0x257   :  { %v3352_v55 = vld [vmem:[#allocation10 + $0x50] ss:$28 sps:$4 sm:$0xff]  }
 0x258   :  { %2381 = vmatpush2.bf16.msra.mxu1 %v3278_v56  ;;  %v3353_v56 = vld [vmem:[#allocation10 + $0x3d0] ss:$28 sps:$4 sm:$0xff]  }
 0x259   :  { %2422 = vmatpush2.bf16.msra.mxu0 %v3281_v57  ;;  %2382 = vmatprep.subr.bf16.mxu1 %v3286_v58  ;;  %v3354_v57 = vld [vmem:[#allocation10 + $0x1d8] ss:$28 sps:$4 sm:$0xff]  }
 0x25a   :  { %2423 = vmatprep.subr.bf16.mxu0 %v3289_v59  ;;  %v3355_v58 = vld [vmem:[#allocation10 + $0x558] ss:$28 sps:$4 sm:$0xff]  }
 0x25b   :  { %v3356_v59 = vld [vmem:[#allocation10 + $0x18] ss:$28 sps:$4 sm:$0xff]  }
 0x25c   :  { %2383 = vmatpush2.bf16.msra.mxu1 %v3284_v60  ;;  %v3357_v60 = vld [vmem:[#allocation10 + $0x398] ss:$28 sps:$4 sm:$0xff]  }
 0x25d   :  { %2424 = vmatpush2.bf16.msra.mxu0 %v3287_v61  ;;  %2384 = vmatprep.subr.bf16.mxu1 %v3292_v62  ;;  %v3616_v61 = vld [vmem:[%s3643_s6] sm:$0xff]  ;;  %s3512_s6 = smov [#allocation11]  }
 0x25e   :  { %2425 = vmatprep.subr.bf16.mxu0 %v3295_v63  ;;  %v1016_v62 = vrot.slane %v3616_v61, %v3571_v23  ;;  %v1020_v63 = vrot.slane %v3616_v61, %v3577_v25  ;;  %v1024_v25 = vrot.slane %v3616_v61, %v327_v43  ;;  %s2546_s30 = sshll.u32 %s3512_s6, 4  ;;  %s2547_s30 = int_to_ptr.vmem [resolvable:$true] %s2546_s30 }
 0x25f   :  { %s3472_s8 = scalar_lea.vmem %s2547_s30, 896  ;;  %p3477_p12 = scmp.lt.s32.totalorder %s2547_s30, %s2547_s30 }
 0x260   :  { %2385 = vmatpush2.bf16.msra.mxu1 %v3290_v0  ;;  %p3473_p11 = scmp.ne.s32.totalorder %s2547_s30, %s3472_s8  ;;  %p3478_p13 = scmp.lt.s32.totalorder %s3472_s8, %s3472_s8 }
 0x261   :  { %2426 = vmatpush2.bf16.msra.mxu0 %v3293_v1  ;;  %2386 = vmatprep.subr.bf16.mxu1 %v3298_v2 }
 0x262   :  { %2427 = vmatprep.subr.bf16.mxu0 %v3301_v3  ;;  %p3479_p0 = por %p3478_p13, %p3477_p12 }
 0x264   :  { %2387 = vmatpush2.bf16.msra.mxu1 %v3296_v4  ;;  %p3480_p1 = pnand %p3479_p0, %p3473_p11 }
 0x265   :  { %2428 = vmatpush2.bf16.msra.mxu0 %v3299_v6  ;;  %2388 = vmatprep.subr.bf16.mxu1 %v3304_v7 }
 0x266   :  { %2429 = vmatprep.subr.bf16.mxu0 %v3307_v10 }
 0x268   :  { %2389 = vmatpush2.bf16.msra.mxu1 %v3302_v12 }
 0x269   :  { %2430 = vmatpush2.bf16.msra.mxu0 %v3305_v13  ;;  %2390 = vmatprep.subr.bf16.mxu1 %v3310_v14 }
 0x26a   :  { %2431 = vmatprep.subr.bf16.mxu0 %v3313_v15  ;;  %v1028_v15 = vrot.slane %v3616_v61, %v331_v45  ;;  %v1031_v45 = vsub.s32 4, %v3568_v22 }
 0x26c   :  { %2391 = vmatpush2.bf16.msra.mxu1 %v3308_v16 }
 0x26d   :  { %2432 = vmatpush2.bf16.msra.mxu0 %v3311_v17  ;;  %2392 = vmatprep.subr.bf16.mxu1 %v3316_v18 }
 0x26e   :  { %2433 = vmatprep.subr.bf16.mxu0 %v3319_v19 }
 0x270   :  { %2393 = vmatpush2.bf16.msra.mxu1 %v3314_v20 }
 0x271   :  { %2434 = vmatpush2.bf16.msra.mxu0 %v3317_v21  ;;  %2394 = vmatprep.subr.bf16.mxu1 %v3322_v24 }
 0x272   :  { %2435 = vmatprep.subr.bf16.mxu0 %v3325_v26 }
 0x274   :  { %2395 = vmatpush2.bf16.msra.mxu1 %v3320_v27 }
 0x275   :  { %2436 = vmatpush2.bf16.msra.mxu0 %v3323_v28  ;;  %2861 = vmatprep.subr.bf16.mxu1 %v3326_v29 }
 0x276   :  { %2883 = vmatprep.subr.bf16.mxu0 %v3327_v30 }
 0x277   :  { %2397 = vmatmul.mubr.bf16.vlgmr.msra.gmra.mxu1 %v3591_v8 }
 0x278   :  { %2438 = vmatmul.mubr.bf16.vlgmr.msra.gmra.mxu0 %v3595_v11  ;;  %2862 = vmatpush3.bf16.msra.mxu1 %v3328_v31 }
 0x279   :  { %2478 = vmatprep.mubr.bf16.mxu1 %v3589_v5  ;;  %2884 = vmatpush3.bf16.msra.mxu0 %v3329_v32  ;;  %v3341_v5 = vld [vmem:[#allocation10 + $0x478] ss:$28 sps:$4 sm:$0xff]   ;;  %v1035_v32 = vsub.s32 5, %v3568_v22 }
 0x27a   :  { %2518 = vmatprep.mubr.bf16.mxu0 %v3593_v9  ;;  %2863 = vmatprep.subr.bf16.mxu1 %v3330_v33  ;;  %v3344_v9 = vld [vmem:[#allocation10 + $0xc0] ss:$28 sps:$4 sm:$0xff]   ;;  %v1032_v33 = vrot.slane %v3616_v61, %v1031_v45 }
 0x27b   :  { %2885 = vmatprep.subr.bf16.mxu0 %v3331_v34  ;;  %v1036_v34 = vrot.slane %v3616_v61, %v1035_v32 }
 0x27c   :  { %2864 = vmatpush3.bf16.msra.mxu1 %v3332_v35 }
 0x27d   :  { %2886 = vmatpush3.bf16.msra.mxu0 %v3333_v36  ;;  %2865 = vmatprep.subr.bf16.mxu1 %v3334_v37 }
 0x27e   :  { %2887 = vmatprep.subr.bf16.mxu0 %v3335_v38 }
 0x280   :  { %2866 = vmatpush3.bf16.msra.mxu1 %v3336_v39 }
 0x281   :  { %2888 = vmatpush3.bf16.msra.mxu0 %v3337_v40  ;;  %2867 = vmatprep.subr.bf16.mxu1 %v3338_v41 }
 0x282   :  { %2889 = vmatprep.subr.bf16.mxu0 %v3339_v42 }
 0x284   :  { %2868 = vmatpush3.bf16.msra.mxu1 %v3340_v44 }
 0x285   :  { %2890 = vmatpush3.bf16.msra.mxu0 %v3341_v5  ;;  %2869 = vmatprep.subr.bf16.mxu1 %v3342_v46 }
 0x286   :  { %2891 = vmatprep.subr.bf16.mxu0 %v3343_v47 }
 0x288   :  { %2870 = vmatpush3.bf16.msra.mxu1 %v3344_v9 }
 0x289   :  { %2892 = vmatpush3.bf16.msra.mxu0 %v3345_v48  ;;  %2871 = vmatprep.subr.bf16.mxu1 %v3346_v49  ;;  %v1039_v49 = vsub.s32 6, %v3568_v22 }
 0x28a   :  { %2893 = vmatprep.subr.bf16.mxu0 %v3347_v50 }
 0x28c   :  { %2872 = vmatpush3.bf16.msra.mxu1 %v3348_v51 }
 0x28d   :  { %2894 = vmatpush3.bf16.msra.mxu0 %v3349_v52  ;;  %2873 = vmatprep.subr.bf16.mxu1 %v3350_v53  ;;  %v1040_v52 = vrot.slane %v3616_v61, %v1039_v49 }
 0x28e   :  { %2895 = vmatprep.subr.bf16.mxu0 %v3351_v54 }
 0x290   :  { %2874 = vmatpush3.bf16.msra.mxu1 %v3352_v55 }
 0x291   :  { %2896 = vmatpush3.bf16.msra.mxu0 %v3353_v56  ;;  %2875 = vmatprep.subr.bf16.mxu1 %v3354_v57 }
 0x292   :  { %2897 = vmatprep.subr.bf16.mxu0 %v3355_v58 }
 0x294   :  { %2876 = vmatpush3.bf16.msra.mxu1 %v3356_v59 }
 0x295   :  { %2898 = vmatpush3.bf16.msra.mxu0 %v3357_v60 }
 0x297   :  { %2479 = vmatmul.mubr.bf16.vlgmr.msra.gmra.mxu1 %v3591_v8 }
 0x298   :  { %2519 = vmatmul.mubr.bf16.vlgmr.msra.gmra.mxu0 %v3595_v11 }
 0x2b7   :  { %v2234_v0 = vpop.f32.mrf.mxu1 }
 0x2b8   :  { %v2235_v1 = vadd.f32 %v2234_v0, %v1016_v62  ;;  %v2275_v2 = vpop.f32.mrf.mxu0 }
 0x2b9   :  { %v2236_v3 = vpop.f32.mrf.mxu1 }
 0x2ba   :  { %v2276_v4 = vadd.f32 %v2275_v2, %v2235_v1  ;;  %v2237_v6 = vadd.f32 %v2236_v3, %v1020_v63  ;;  %v2277_v8 = vpop.f32.mrf.mxu0 }
 0x2bb   :  { %v2238_v7 = vpop.f32.mrf.mxu1 }
 0x2bc   :  { %3358 = vtanh.f32 %v2276_v4  ;;  %v2278_v11 = vadd.f32 %v2277_v8, %v2237_v6  ;;  %v2279_v10 = vpop.f32.mrf.mxu0 }
 0x2bd   :  { %v2239_v12 = vpop.f32.mrf.mxu1 }
 0x2be   :  { %3360 = vtanh.f32 %v2278_v11  ;;  %v2280_v13 = vpop.f32.mrf.mxu0 }
 0x2c9   :  { %v3359_v14 = vpop.eup %3358 }
 0x2ca   :  { %2533 = vst [vmem:[#allocation11] sm:$0xff] %v3359_v14 }
 0x2cb   :  { %v3361_v23 = vpop.eup %3360 }
 0x2cc   :  { %2534 = vst [vmem:[#allocation11 + $0x8] sm:$0xff] %v3361_v23 }
 0x2f7   :  { %v2316_v16 = vpop.f32.mrf.mxu1 }
 0x2f8   :  { %v2317_v17 = vadd.f32 %v2316_v16, %v1024_v25  ;;  %v2357_v18 = vpop.f32.mrf.mxu0 }
 0x2f9   :  { %v2318_v19 = vpop.f32.mrf.mxu1 }
 0x2fa   :  { %v2358_v20 = vadd.f32 %v2357_v18, %v2317_v17  ;;  %v2319_v21 = vadd.f32 %v2318_v19, %v1028_v15  ;;  %v2359_v24 = vpop.f32.mrf.mxu0 }
 0x2fb   :  { %v2320_v26 = vpop.f32.mrf.mxu1 }
 0x2fc   :  { %3362 = vtanh.f32 %v2358_v20  ;;  %v2360_v27 = vadd.f32 %v2359_v24, %v2319_v21  ;;  %v2361_v28 = vpop.f32.mrf.mxu0 }
 0x2fd   :  { %v2321_v29 = vpop.f32.mrf.mxu1 }
 0x2fe   :  { %3364 = vtanh.f32 %v2360_v27  ;;  %v2362_v30 = vpop.f32.mrf.mxu0 }
 0x309   :  { %v3363_v31 = vpop.eup %3362 }
 0x30a   :  { %2535 = vst [vmem:[#allocation11 + $0x10] sm:$0xff] %v3363_v31 }
 0x30b   :  { %v3365_v43 = vpop.eup %3364 }
 0x30c   :  { %2536 = vst [vmem:[#allocation11 + $0x18] sm:$0xff] %v3365_v43 }
 0x337   :  { %v2398_v35 = vpop.f32.mrf.mxu1 }
 0x338   :  { %v2399_v36 = vadd.f32 %v2398_v35, %v1032_v33  ;;  %v2439_v37 = vpop.f32.mrf.mxu0 }
 0x339   :  { %v2400_v38 = vpop.f32.mrf.mxu1 }
 0x33a   :  { %v2440_v39 = vadd.f32 %v2439_v37, %v2399_v36  ;;  %v2401_v40 = vadd.f32 %v2400_v38, %v1036_v34  ;;  %v2441_v41 = vpop.f32.mrf.mxu0 }
 0x33b   :  { %v2402_v42 = vpop.f32.mrf.mxu1 }
 0x33c   :  { %3366 = vtanh.f32 %v2440_v39  ;;  %v2442_v44 = vadd.f32 %v2441_v41, %v2401_v40  ;;  %v2443_v5 = vpop.f32.mrf.mxu0 }
 0x33d   :  { %v2403_v46 = vpop.f32.mrf.mxu1 }
 0x33e   :  { %3368 = vtanh.f32 %v2442_v44  ;;  %v2444_v47 = vpop.f32.mrf.mxu0 }
 0x349   :  { %v3367_v9 = vpop.eup %3366 }
 0x34a   :  { %2537 = vst [vmem:[#allocation11 + $0x20] sm:$0xff] %v3367_v9 }
 0x34b   :  { %v3369_v48 = vpop.eup %3368 }
 0x34c   :  { %2538 = vst [vmem:[#allocation11 + $0x28] sm:$0xff] %v3369_v48 }
 0x357   :  { %v2877_v50 = vpop.f32.mrf.mxu1 }
 0x358   :  { %v2899_v51 = vpop.f32.mrf.mxu0 }
 0x359   :  { %v2878_v53 = vpop.f32.mrf.mxu1 }
 0x35a   :  { %v2879_v54 = vadd.f32 %v2878_v53, %v2877_v50  ;;  %v2900_v55 = vpop.f32.mrf.mxu0 }
 0x35b   :  { %v2880_v56 = vpop.f32.mrf.mxu1  ;;  %v2901_v58 = vadd.f32 %v2900_v55, %v2899_v51 }
 0x35c   :  { %v2481_v57 = vadd.f32 %v2879_v54, %v1040_v52  ;;  %v2902_v59 = vpop.f32.mrf.mxu0 }
 0x35d   :  { %v2881_v60 = vpop.f32.mrf.mxu1 }
 0x35e   :  { %v2521_v62 = vadd.f32 %v2901_v58, %v2481_v57  ;;  %v2903_v63 = vpop.f32.mrf.mxu0 }
 0x360   :  { %3370 = vtanh.f32 %v2521_v62 }
 0x36d   :  { %v3371_v0 = vpop.eup %3370 }
 0x36e   :  { %2539 = vst [vmem:[#allocation11 + $0x30] sm:$0xff] %v3371_v0 }
 0x36f   :  { %3483 = shalt.err (!%p3480_p1)
}
 0x370   :  { %2549 = dma.vmem_to_hbm [thread:$0]  %s2547_s30, 896, %s3644_s7, [#allocation4]  }
 0x371   :  { %3498 = dma.done.wait [#allocation4], 896  }
 0x372   :  { %3499 = vsyncadd [#allocation4], 4294966400 }
 0x373   :  { %2553 = vsyncpa [#allocation3], 1 }
 0x374   :  { %2554 = vsyncpa [#allocation6], 1 }
 0x375   :  { %2555 = vsyncpa [#allocation9], 1 }
 0x376   :  { %2556 = vsyncpa [#allocation4], 1 }

</bundles_post_ra>
